<compile_context>
chip_gen: v6e
topology: v6e:2x2x1
jax: 0.10.0
libtpu: 0.0.40
codegen_flags: <defaults>
</compile_context>

<pallas_src>
import jax
import jax.numpy as jnp
from jax.experimental import pallas as pl
from jax.experimental.pallas import tpu as pltpu

OUT_DIM = 768 * 3  # fixed by the module: nn.Linear(hidden_dim, 768 * 3)


def ffnn_kernel(x_ref, w1_ref, b1_ref, w2_ref, b2_ref, out_ref):
    """One row-tile of the MLP: out = relu(x @ W1 + b1) @ W2 + b2."""
    # x_ref:  [TILE_N, E]   bf16
    # w1_ref: [E, H]        bf16 (resident across grid)
    # b1_ref: [1, H]        f32  (resident)
    # w2_ref: [H, OUT]      bf16 (resident)
    # b2_ref: [1, OUT]      f32  (resident)
    # out_ref:[TILE_N, OUT] f32  (lane-dense: OUT = 2304 = 18*128)
    h = jnp.dot(x_ref[...], w1_ref[...],
                preferred_element_type=jnp.float32) + b1_ref[...]
    h = jnp.maximum(h, 0.0)                 # ReLU; Dropout(0.2) = identity (eval)
    h = h.astype(jnp.bfloat16)              # bf16 operand for the second MXU pass
    out_ref[...] = jnp.dot(h, w2_ref[...],
                           preferred_element_type=jnp.float32) + b2_ref[...]


def _choose_tile_n(n):
    """Row tile: multiple of 8, capped so f32 output slab stays ~2-5 MiB/buffer."""
    for t in (512, 256, 128, 64, 32, 16, 8):
        if n >= t:
            return t
    return 8


def ffnn_forward(x, params, *, tile_n=None):
    """Pallas-backed forward of the ffnn module. Returns [n, 2304] float32."""
    n, e = x.shape
    w1, b1, w2, b2 = params
    h = w1.shape[1]
    out_dim = w2.shape[1]

    if tile_n is None:
        tile_n = _choose_tile_n(n)

    # Pad rows to a multiple of tile_n so every grid step sees a full tile;
    # padded rows are sliced off at the end.
    n_pad = pl.cdiv(n, tile_n) * tile_n
    if n_pad != n:
        x = jnp.pad(x, ((0, n_pad - n), (0, 0)))

    # bf16 matmul operands (halved HBM traffic); biases stay f32.
    x_bf = x.astype(jnp.bfloat16)
    w1_bf = w1.astype(jnp.bfloat16)
    w2_bf = w2.astype(jnp.bfloat16)
    b1_f = b1.astype(jnp.float32).reshape(1, h)
    b2_f = b2.astype(jnp.float32).reshape(1, out_dim)

    grid = (n_pad // tile_n,)

    flops = 2 * n_pad * (e * h + h * out_dim)
    bytes_accessed = (n_pad * e * 2            # x (bf16)
                      + e * h * 2 + h * 4      # W1 (bf16) + b1 (f32)
                      + h * out_dim * 2        # W2 (bf16)
                      + out_dim * 4            # b2 (f32)
                      + n_pad * out_dim * 4)   # output (f32)

    out = pl.pallas_call(
        ffnn_kernel,
        out_shape=jax.ShapeDtypeStruct((n_pad, out_dim), jnp.float32),
        grid_spec=pltpu.PrefetchScalarGridSpec(
            num_scalar_prefetch=0,
            grid=grid,
            in_specs=[
                pl.BlockSpec((tile_n, e), lambda i: (i, 0)),       # x tile
                pl.BlockSpec((e, h), lambda i: (0, 0)),            # W1 resident
                pl.BlockSpec((1, h), lambda i: (0, 0)),            # b1 resident
                pl.BlockSpec((h, out_dim), lambda i: (0, 0)),      # W2 resident
                pl.BlockSpec((1, out_dim), lambda i: (0, 0)),      # b2 resident
            ],
            out_specs=pl.BlockSpec((tile_n, out_dim), lambda i: (i, 0)),
        ),
        compiler_params=pltpu.CompilerParams(
            # Row tiles are independent -> shard across v7x's 2 TensorCores.
            dimension_semantics=("parallel",),
        ),
        cost_estimate=pl.CostEstimate(
            flops=flops, transcendentals=0, bytes_accessed=bytes_accessed),
    )(x_bf, w1_bf, b1_f, w2_bf, b2_f)

    return out[:n]


def init_params(key, embeds_dim, hidden_dim):
    """Deterministic synthetic init. Weights stored [in, out]."""
    k1, k2 = jax.random.split(key, 2)
    w1 = jax.random.normal(k1, (embeds_dim, hidden_dim), jnp.float32) * 0.05
    b1 = jnp.zeros((1, hidden_dim), jnp.float32)
    w2 = jax.random.normal(k2, (hidden_dim, OUT_DIM), jnp.float32) * 0.05
    b2 = jnp.zeros((1, OUT_DIM), jnp.float32)
    return (w1, b1, w2, b2)


def reference_forward(x, params):
    """Pure-JAX reference mirroring the module (eval mode) with the same
    mixed-precision policy (bf16 matmul operands, f32 accumulation)."""
    w1, b1, w2, b2 = params
    h = jnp.dot(x.astype(jnp.bfloat16), w1.astype(jnp.bfloat16),
                preferred_element_type=jnp.float32) + b1
    h = jnp.maximum(h, 0.0)
    out = jnp.dot(h.astype(jnp.bfloat16), w2.astype(jnp.bfloat16),
                  preferred_element_type=jnp.float32) + b2
    return out


if __name__ == "__main__":
    # Small shapes consistent with the module:
    #   x: [n, embeds_dim]; hidden_dim = 150 (module default); output = 768*3.
    n = 200                  # not a multiple of the tile -> exercises row padding
    embeds_dim = 128
    hidden_dim = 150

    key = jax.random.PRNGKey(0)
    kx, kp = jax.random.split(key, 2)
    x = jax.random.normal(kx, (n, embeds_dim), jnp.float32)
    params = init_params(kp, embeds_dim, hidden_dim)

    out = ffnn_forward(x, params)
    jax.block_until_ready(out)

    ref = reference_forward(x, params)
    assert out.shape == (n, OUT_DIM), out.shape
    assert jnp.allclose(out, ref, atol=1e-2, rtol=1e-2), (
        float(jnp.max(jnp.abs(out - ref))))

    print("KERNEL_OK")
</pallas_src>

<mosaic_0001>
module attributes {stable_mosaic.version = 11 : i64} {
  func.func @ffnn_kernel(%arg0: i32, %arg1: memref<128x128xbf16, #tpu.memory_space<vmem>>, %arg2: memref<128x150xbf16, #tpu.memory_space<vmem>>, %arg3: memref<1x150xf32, #tpu.memory_space<vmem>>, %arg4: memref<150x2304xbf16, #tpu.memory_space<vmem>>, %arg5: memref<1x2304xf32, #tpu.memory_space<vmem>>, %arg6: memref<128x2304xf32, #tpu.memory_space<vmem>>) attributes {dimension_semantics = [#tpu.dimension_semantics<parallel>], iteration_bounds = array<i64: 2>, scalar_prefetch = 0 : i64, scratch_operands = 0 : i64, tpu.core_type = #tpu.core_type<tc>, window_params = [{transform_indices = @transform_0, window_bounds = array<i64: 128, 128>}, {pipeline_mode = #tpu.pipeline_mode<synchronous>, transform_indices = @transform_1, window_bounds = array<i64: 128, 150>}, {pipeline_mode = #tpu.pipeline_mode<synchronous>, transform_indices = @transform_2, window_bounds = array<i64: 1, 150>}, {pipeline_mode = #tpu.pipeline_mode<synchronous>, transform_indices = @transform_3, window_bounds = array<i64: 150, 2304>}, {pipeline_mode = #tpu.pipeline_mode<synchronous>, transform_indices = @transform_4, window_bounds = array<i64: 1, 2304>}, {transform_indices = @transform_5, window_bounds = array<i64: 128, 2304>}]} {
    %c0 = arith.constant 0 : index
    %c0_0 = arith.constant 0 : index
    %0 = vector.load %arg1[%c0, %c0_0] : memref<128x128xbf16, #tpu.memory_space<vmem>>, vector<128x128xbf16>
    %c0_1 = arith.constant 0 : index
    %c0_2 = arith.constant 0 : index
    %1 = vector.load %arg2[%c0_1, %c0_2] : memref<128x150xbf16, #tpu.memory_space<vmem>>, vector<128x150xbf16>
    %cst = arith.constant dense<0.000000e+00> : vector<128x150xf32>
    %2 = tpu.matmul %0, %1, %cst {dimension_numbers = #tpu.dot_dimension_numbers<[1], [0], [0], [1], [0, 0, 1, 1], [], []>} : vector<128x128xbf16>, vector<128x150xbf16>, vector<128x150xf32> -> vector<128x150xf32>
    %c0_3 = arith.constant 0 : index
    %c0_4 = arith.constant 0 : index
    %3 = vector.load %arg3[%c0_3, %c0_4] : memref<1x150xf32, #tpu.memory_space<vmem>>, vector<1x150xf32>
    %4 = vector.broadcast %3 : vector<1x150xf32> to vector<128x150xf32>
    %5 = arith.addf %2, %4 : vector<128x150xf32>
    %cst_5 = arith.constant 0.000000e+00 : f32
    %6 = vector.broadcast %cst_5 : f32 to vector<128x150xf32>
    %7 = arith.maximumf %5, %6 : vector<128x150xf32>
    %8 = arith.truncf %7 : vector<128x150xf32> to vector<128x150xbf16>
    %c0_6 = arith.constant 0 : index
    %c0_7 = arith.constant 0 : index
    %9 = vector.load %arg4[%c0_6, %c0_7] : memref<150x2304xbf16, #tpu.memory_space<vmem>>, vector<150x2304xbf16>
    %cst_8 = arith.constant dense<0.000000e+00> : vector<128x2304xf32>
    %10 = tpu.matmul %8, %9, %cst_8 {dimension_numbers = #tpu.dot_dimension_numbers<[1], [0], [0], [1], [0, 0, 1, 1], [], []>} : vector<128x150xbf16>, vector<150x2304xbf16>, vector<128x2304xf32> -> vector<128x2304xf32>
    %c0_9 = arith.constant 0 : index
    %c0_10 = arith.constant 0 : index
    %11 = vector.load %arg5[%c0_9, %c0_10] : memref<1x2304xf32, #tpu.memory_space<vmem>>, vector<1x2304xf32>
    %12 = vector.broadcast %11 : vector<1x2304xf32> to vector<128x2304xf32>
    %13 = arith.addf %10, %12 : vector<128x2304xf32>
    %c0_11 = arith.constant 0 : index
    %c0_12 = arith.constant 0 : index
    %14 = vector.load %arg6[%c0_11, %c0_12] : memref<128x2304xf32, #tpu.memory_space<vmem>>, vector<128x2304xf32>
    tpu.vector_store %arg6[%c0_11, %c0_12], %13 {strides = array<i32>} : memref<128x2304xf32, #tpu.memory_space<vmem>>, vector<128x2304xf32>,
    return
  }
  func.func @transform_0(%arg0: i32) -> (i32, i32) {
    %c0_i32 = arith.constant 0 : i32
    %c0_i32_0 = arith.constant 0 : i32
    return %arg0, %c0_i32 : i32, i32
  }
  func.func @transform_1(%arg0: i32) -> (i32, i32) {
    %c0_i32 = arith.constant 0 : i32
    %c0_i32_0 = arith.constant 0 : i32
    %c0_i32_1 = arith.constant 0 : i32
    return %c0_i32, %c0_i32_0 : i32, i32
  }
  func.func @transform_2(%arg0: i32) -> (i32, i32) {
    %c0_i32 = arith.constant 0 : i32
    %c0_i32_0 = arith.constant 0 : i32
    %c0_i32_1 = arith.constant 0 : i32
    return %c0_i32, %c0_i32_0 : i32, i32
  }
  func.func @transform_3(%arg0: i32) -> (i32, i32) {
    %c0_i32 = arith.constant 0 : i32
    %c0_i32_0 = arith.constant 0 : i32
    %c0_i32_1 = arith.constant 0 : i32
    return %c0_i32, %c0_i32_0 : i32, i32
  }
  func.func @transform_4(%arg0: i32) -> (i32, i32) {
    %c0_i32 = arith.constant 0 : i32
    %c0_i32_0 = arith.constant 0 : i32
    %c0_i32_1 = arith.constant 0 : i32
    return %c0_i32, %c0_i32_0 : i32, i32
  }
  func.func @transform_5(%arg0: i32) -> (i32, i32) {
    %c0_i32 = arith.constant 0 : i32
    %c0_i32_0 = arith.constant 0 : i32
    return %arg0, %c0_i32 : i32, i32
  }
}

</mosaic_0001>

<bundles_post_ra>
// kernel: tpu_custom_call.1
= control target key start
LH: loop header
LB: loop body
LE: loop exit
PB: predicated region body
PF: predicated region fallthrough
CT: control target
= control target key end

     0   :  { %10 = vsyncpa [#allocation3], 0  ;;  %s5399_s0 = inlined_call_operand.hbm [shape: bf16[256,128], index: 0, kind: input, shape index: {}]   ;;  %s5400_s1 = inlined_call_operand.vmem [shape: bf16[128,150], index: 1, kind: input, shape index: {}]   ;;  %s5401_s2 = inlined_call_operand.hbm [shape: f32[1,150], index: 2, kind: input, shape index: {}]   ;;  %s5402_s3 = inlined_call_operand.hbm [shape: bf16[150,2304], index: 3, kind: input, shape index: {}]   ;;  %s5403_s4 = inlined_call_operand.hbm [shape: f32[1,2304], index: 4, kind: input, shape index: {}]   ;;  %s5404_s5 = inlined_call_operand.hbm [shape: f32[256,2304], index: 5, kind: output, shape index: {}]  }
   0x1   :  { %12 = vsyncpa [#allocation3 + $0x1], 0 }
   0x2   :  { %13 = vsyncpa [#allocation6], 0 }
   0x3   :  { %14 = vsyncpa [#allocation9], 0 }
   0x4   :  { %15 = vsyncpa [#allocation4], 0 }
   0x5   :  { %17 = vsyncpa [#allocation4 + $0x1], 0  ;;  %s4149_s18 = smov 0   ;;  %s4151_s19 = smov 0  }
   0x6   :  { %s4153_s20 = smov 0   ;;  %s4155_s21 = smov 0  }
   0x7 LB: > { %s4170_s22 = sadd.s32 4294967295, %s4105_s21   ;;  %s3243_s23 = sadd.s32 4294967294, %s4105_s21   ;;  %s4105_s21 = sphi %s4155_s21, %s5428_s21   ;;  %s4101_s20 = sphi %s4153_s20, %s5427_s20   ;;  %s4097_s19 = sphi %s4151_s19, %s5426_s19   ;;  %s4093_s18 = sphi %s4149_s18, %s5425_s18  }
   0x8   : > { %p43_p0 = scmp.ne.s32.totalorder %s4097_s19, %s4093_s18  ;;  %p5405_p1 = scmp.eq.s32.totalorder %s4170_s22, 0 }
   0x9   : > { %p157_p3 = scmp.eq.s32.totalorder %s3243_s23, 1  ;;  %p3244_p5 = scmp.ge.s32.totalorder %s4105_s21, 1 }
   0xa   : > { %p4179_p4 = por %p5405_p1, %p43_p0  ;;  %p164_p7 = scmp.lt.s32.totalorder %s4105_s21, 3 }
   0xb   : > { %p4184_p6 = por %p157_p3, %p43_p0  ;;  %s4107_s27 = smov [#allocation5]  }
   0xc   : > { %s5409_s24 = scalar_select %p4179_p4, 1, 0 }
   0xd   : > { %s5410_s25 = scalar_select %p4184_p6, 1, 0 }
   0xe   : > { %p4189_p8 = pnand %p3244_p5, %p164_p7  ;;  %s180_s28 = sshll.u32 %s4107_s27, 4  ;;  %s181_s28 = int_to_ptr.vmem [resolvable:$true] %s180_s28 }
   0xf   : > { %s4108_s29 = smov [#allocation7]   ;;  %s4109_s7 = smov [#allocation8]  }
  0x10   : > { %s5411_s26 = scalar_select %p4189_p8, 1, 0 }
  0x11   : > { %p3566_p10 = pneg %p4189_p8  ;;  %s190_s30 = sshll.u32 %s4108_s29, 4  ;;  %s191_s30 = int_to_ptr.vmem [resolvable:$true] %s190_s30 }
  0x12   : > { %s204_s8 = sshll.u32 %s4109_s7, 4  ;;  %s3938_s9 = scalar_lea.vmem %s181_s28, 32  ;;  %s205_s8 = int_to_ptr.vmem [resolvable:$true] %s204_s8 }
  0x13   : > { %p4198_p11 = pnand %p3566_p10, %p5405_p1  ;;  %p3939_p13 = scmp.ne.s32.totalorder %s181_s28, %s3938_s9 }
  0x14   : > { %p3946_p5 = scmp.lt.s32.totalorder %s181_s28, %s181_s28  ;;  %p3947_p7 = scmp.lt.s32.totalorder %s3938_s9, %s3938_s9 }
  0x15   : > { %p3929_p12 = pneg %p4198_p11 }
  0x16   : > { %p3948_p9 = por %p3947_p7, %p3946_p5 }
  0x17   : > { %p3941_p0 = pnand %p3939_p13, %p3929_p12 }
  0x19   : > { %p3942_p3 = pneg %p3941_p0 }
  0x1b   : > { %p3949_p10 = pnand %p3948_p9, %p3942_p3 }
  0x1d   : > { %3952 = shalt.err (!%p3949_p10)
}
  0x1e   : > { %3569 = dma.hbm_to_vmem [thread:$0]  (!%p4198_p11), %s5401_s2, 32, %s181_s28, [#allocation6]  }
  0x1f   : > { %s3964_s12 = scalar_lea.vmem %s191_s30, 21888  ;;  %p3972_p13 = scmp.lt.s32.totalorder %s191_s30, %s191_s30 }
  0x20   : > { %p3965_p1 = scmp.ne.s32.totalorder %s191_s30, %s3964_s12  ;;  %p3973_p0 = scmp.lt.s32.totalorder %s3964_s12, %s3964_s12 }
  0x22   : > { %p3967_p2 = pnand %p3965_p1, %p3929_p12  ;;  %p3974_p4 = por %p3973_p0, %p3972_p13 }
  0x24   : > { %p3968_p6 = pneg %p3967_p2 }
  0x26   : > { %p3975_p8 = pnand %p3974_p4, %p3968_p6 }
  0x28   : > { %3978 = shalt.err (!%p3975_p8)
}
  0x29   : > { %s4110_s13 = smov 1152   ;;  %s4111_s14 = smov 72  }
  0x2a   : > { %3572 = dma.hbm_to_vmem [thread:$0]  (!%p4198_p11), %s5402_s3, 21888, %s191_s30, [#allocation6], %s4110_s13, %s4110_s13, %s4111_s14  }
  0x2b   : > { %s3990_s17 = scalar_lea.vmem %s205_s8, 288  ;;  %p3998_p3 = scmp.lt.s32.totalorder %s205_s8, %s205_s8 }
  0x2c   : > { %p3991_p9 = scmp.ne.s32.totalorder %s205_s8, %s3990_s17  ;;  %p3999_p5 = scmp.lt.s32.totalorder %s3990_s17, %s3990_s17 }
  0x2e   : > { %p3993_p1 = pnand %p3991_p9, %p3929_p12  ;;  %p4000_p4 = por %p3999_p5, %p3998_p3 }
  0x30   : > { %p3994_p2 = pneg %p3993_p1 }
  0x32   : > { %p4001_p6 = pnand %p4000_p4, %p3994_p2 }
  0x34   : > { %4004 = shalt.err (!%p4001_p6)
}
  0x35   : > { %3575 = dma.hbm_to_vmem [thread:$0]  (!%p4198_p11), %s5403_s4, 288, %s205_s8, [#allocation9]  }
  0x36   : > { %s4229_s28 = sadd.s32 1, %s4105_s21   ;;  %s30_s30 = sadd.s32 1, %s4101_s20 }
  0x37   : > { %s27_s29 = ssub.s32 %s4105_s21, %s4229_s28  ;;  %p37_p12 = scmp.ne.s32.totalorder %s4101_s20, %s4097_s19 }
  0x38   : > { %p28_p8 = scmp.eq.s32.totalorder %s27_s29, 0  ;;  %p38_p7 = scmp.eq.s32.totalorder %s4105_s21, 0 }
  0x39   : > { %p3587_p10 = scmp.lt.s32.totalorder %s4105_s21, 2  ;;  %p5413_p0 = scmp.eq.s32.totalorder %s4170_s22, 1 }
  0x3a   : > { %s4239_s6 = scalar_select %p28_p8, %s4101_s20, %s30_s30  }
  0x3b   : > { %p39_p13 = por %p38_p7, %p37_p12  ;;  %p4243_p9 = por %p5413_p0, %p37_p12 }
  0x3c   : > { %s215_s9 = sand.u32 1, %s4101_s20   ;;  %s3547_s10 = sshll.u32 %s4105_s21, 10 }
  0x3d   : > { %s5414_s7 = scalar_select %p4243_p9, 1, 0 }
  0x3e   : > { %s3249_s8 = sshll.u32 %s215_s9, 6  ;;  %s4252_s13 = scalar_lea.hbm %s5399_s0, %s3547_s10 }
  0x3f   : > { %s219_s14 = scalar_lea.vmem [#allocation2], %s3249_s8  ;;  %p4254_p11 = pnand %p3587_p10, %p39_p13 }
  0x40   : > { %s226_s15 = sshll.u32 %s219_s14, 4  ;;  %s4260_s17 = scalar_lea.sflag [#allocation3], %s215_s9  ;;  %s4258_s15 = int_to_ptr.vmem [resolvable:$true] %s226_s15 }
  0x41   : > { %s4005_s23 = scalar_lea.hbm %s4252_s13, 1024  ;;  %p4007_p2 = pneg %p4254_p11 }
  0x42   : > { %p4006_p1 = scmp.ne.s32.totalorder %s4252_s13, %s4005_s23  ;;  %s4010_s30 = scalar_lea.hbm %s5399_s0, 2048 }
  0x43   : > { %p4011_p4 = scmp.lt.s32.totalorder %s4252_s13, %s5399_s0  ;;  %p4012_p6 = scmp.lt.s32.totalorder %s4010_s30, %s4005_s23 }
  0x44   : > { %p4008_p3 = pnand %p4007_p2, %p4006_p1 }
  0x45   : > { %p4013_p8 = por %p4012_p6, %p4011_p4 }
  0x46   : > { %p4009_p5 = pneg %p4008_p3 }
  0x48   : > { %p4014_p12 = pnand %p4013_p8, %p4009_p5 }
  0x4a   : > { %4017 = shalt.err (!%p4014_p12)
}
  0x4b   : > { %s4018_s9 = scalar_lea.vmem %s4258_s15, 1024  ;;  %s4112_s11 = smov [#allocation2]  }
  0x4c   : > { %p4019_p7 = scmp.ne.s32.totalorder %s4258_s15, %s4018_s9  ;;  %s4023_s12 = sshll.u32 %s4112_s11, 4  ;;  %s4024_s12 = int_to_ptr.vmem [resolvable:$false] %s4023_s12 }
  0x4d   : > { %s4025_s14 = scalar_lea.vmem %s4024_s12, 2048  ;;  %p4026_p0 = scmp.lt.s32.totalorder %s4258_s15, %s4024_s12 }
  0x4e   : > { %p4021_p10 = pnand %p4019_p7, %p4007_p2  ;;  %p4027_p1 = scmp.lt.s32.totalorder %s4025_s14, %s4018_s9 }
  0x50   : > { %p4022_p13 = pneg %p4021_p10  ;;  %p4028_p3 = por %p4027_p1, %p4026_p0 }
  0x52   : > { %p4029_p9 = pnand %p4028_p3, %p4022_p13 }
  0x54   : > { %4032 = shalt.err (!%p4029_p9)
}
  0x55   : > { %s4113_s23 = smov 64   ;;  %s4114_s27 = smov 4  }
  0x56   : > { %3579 = dma.hbm_to_vmem [thread:$0]  (!%p4254_p11), %s4252_s13, 1024, %s4258_s15, %s4260_s17, %s4113_s23, %s4113_s23, %s4114_s27  }
  0x57   : > { %p5416_p2 = scmp.ne.s32.totalorder %s5411_s26, 0 }
  0x58   : > { %s4284_s29 = sand.u32 (!%p5416_p2), 1, %s4097_s19   ;;  %p5417_p9 = scmp.ne.s32.totalorder (!%p5416_p2), %s5409_s24, 0 }
  0x59   : > { %238 = sbr.rel (%p5416_p2) target bundleno = 868 (0x364), region = 40  ;;  %s3253_s30 = sshll.u32 (!%p5416_p2), %s4284_s29, 6 }
  0x5a   : > { %s241_s10 = scalar_lea.sflag (!%p5416_p2), [#allocation3], %s4284_s29  ;;  %s4288_s8 = scalar_lea.vmem (!%p5416_p2), [#allocation2], %s3253_s30 }
  0x5e   : > { %4076 = dma.done.wait (%p5417_p9), %s241_s10, 1024  }
  0x5f   : > { %4078 = vsyncadd (%p5417_p9), %s241_s10, 4294966272  ;;  %p5418_p11 = scmp.eq.s32.totalorder %s4170_s22, 0 }
  0x61   : > { %4080 = dma.done.wait (%p5418_p11), [#allocation6], 21920   ;;  %p5419_p5 = pmov %p5418_p11 }
  0x63   : > { %4082 = vsyncadd (%p5419_p5), [#allocation6], 4294945376  ;;  %p5420_p4 = pmov %p5419_p5 }
  0x65   : > { %4084 = dma.done.wait (%p5420_p4), [#allocation9], 288   ;;  %p5421_p6 = pmov %p5420_p4 }
  0x66   : > { %v4115_v0 = vmov 0   ;;  %v3634_v1 = vld [vmem:[%s5400_s1 + $0x74] ss:$8 sps:$4 sm:$0xff]   ;;  %v3636_v2 = vld [vmem:[%s5400_s1 + $0x70] ss:$8 sps:$4 sm:$0xff]   ;;  %v3658_v25 = vld [vmem:[%s4288_s8] sm:$0xff]  }
  0x67   : > { %4086 = vsyncadd (%p5421_p6), [#allocation9], 4294967008  ;;  %490 = vmatprep.mubr.bf16.mxu0 %v4115_v0  ;;  %458 = vmatprep.subr.bf16.mxu0 %v3634_v1  ;;  %v3637_v3 = vld [vmem:[%s5400_s1 + $0x64] ss:$8 sps:$4 sm:$0xff]   ;;  %v3639_v4 = vld [vmem:[%s5400_s1 + $0x60] ss:$8 sps:$4 sm:$0xff]  }
  0x68   : > { %459 = vmatpush1.bf16.msra.mxu0 %v3636_v2  ;;  %v3640_v5 = vld [vmem:[%s5400_s1 + $0x54] ss:$8 sps:$4 sm:$0xff]   ;;  %v3642_v6 = vld [vmem:[%s5400_s1 + $0x50] ss:$8 sps:$4 sm:$0xff]   ;;  %v3643_v7 = vld [vmem:[%s5400_s1 + $0x44] ss:$8 sps:$4 sm:$0xff]  }
  0x69   : > { %460 = vmatprep.subr.bf16.mxu0 %v3637_v3  ;;  %v3645_v8 = vld [vmem:[%s5400_s1 + $0x40] ss:$8 sps:$4 sm:$0xff]   ;;  %v3646_v9 = vld [vmem:[%s5400_s1 + $0x34] ss:$8 sps:$4 sm:$0xff]   ;;  %v3648_v10 = vld [vmem:[%s5400_s1 + $0x30] ss:$8 sps:$4 sm:$0xff]  }
  0x6a   : > { %v3649_v11 = vld [vmem:[%s5400_s1 + $0x24] ss:$8 sps:$4 sm:$0xff]   ;;  %v3651_v12 = vld [vmem:[%s5400_s1 + $0x20] ss:$8 sps:$4 sm:$0xff]   ;;  %v3668_v14 = vld [vmem:[#allocation7 + $0x3f0] ss:$72 sps:$4 sm:$0xff]  }
  0x6b   : > { %v3666_v13 = vld [vmem:[#allocation7 + $0x3f4] ss:$72 sps:$4 sm:$0xff]   ;;  %v3672_v16 = vld [vmem:[#allocation7 + $0x364] ss:$72 sps:$4 sm:$0xff]   ;;  %v3674_v17 = vld [vmem:[#allocation7 + $0x360] ss:$72 sps:$4 sm:$0xff]  }
  0x6c   : > { %461 = vmatpush1.bf16.msra.mxu0 %v3639_v4  ;;  %v3652_v15 = vld [vmem:[%s5400_s1 + $0x14] ss:$8 sps:$4 sm:$0xff]   ;;  %1821 = vmatprep.subr.bf16.mxu1 %v3666_v13  ;;  %v3654_v18 = vld [vmem:[%s5400_s1 + $0x10] ss:$8 sps:$4 sm:$0xff]   ;;  %v3655_v19 = vld [vmem:[%s5400_s1 + $0x4] ss:$8 sps:$4 sm:$0xff]  }
  0x6d   : > { %462 = vmatprep.subr.bf16.mxu0 %v3640_v5  ;;  %1822 = vmatpush1.bf16.msra.mxu1 %v3668_v14  ;;  %v3678_v20 = vld [vmem:[#allocation7 + $0x2d4] ss:$72 sps:$4 sm:$0xff]   ;;  %v3680_v21 = vld [vmem:[#allocation7 + $0x2d0] ss:$72 sps:$4 sm:$0xff]   ;;  %v3684_v23 = vld [vmem:[#allocation7 + $0x244] ss:$72 sps:$4 sm:$0xff]  }
  0x6e   : > { %1823 = vmatprep.subr.bf16.mxu1 %v3672_v16  ;;  %v3657_v22 = vld [vmem:[%s5400_s1] ss:$8 sps:$4 sm:$0xff]   ;;  %v3677_v28 = vld [vmem:[#allocation7 + $0x36c] ss:$72 sps:$4 sm:$0xff]   ;;  %v3692_v30 = vld [vmem:[#allocation7 + $0x1b0] ss:$72 sps:$4 sm:$0xff]  }
  0x6f   : > { %v3671_v24 = vld [vmem:[#allocation7 + $0x3fc] ss:$72 sps:$4 sm:$0xff]   ;;  %v3686_v26 = vld [vmem:[#allocation7 + $0x240] ss:$72 sps:$4 sm:$0xff]   ;;  %v3689_v37 = vld [vmem:[#allocation7 + $0x24c] ss:$72 sps:$4 sm:$0xff]  }
  0x70   : > { %463 = vmatpush1.bf16.msra.mxu0 %v3642_v6  ;;  %v3669_v27 = vld [vmem:[#allocation7 + $0x3f8] ss:$72 sps:$4 sm:$0xff]   ;;  %v3690_v29 = vld [vmem:[#allocation7 + $0x1b4] ss:$72 sps:$4 sm:$0xff]   ;;  %v3675_v31 = vld [vmem:[#allocation7 + $0x368] ss:$72 sps:$4 sm:$0xff]  }
  0x71   : > { %464 = vmatprep.subr.bf16.mxu0 %v3643_v7  ;;  %1824 = vmatpush1.bf16.msra.mxu1 %v3674_v17  ;;  %v3696_v32 = vld [vmem:[#allocation7 + $0x124] ss:$72 sps:$4 sm:$0xff]   ;;  %v3681_v35 = vld [vmem:[#allocation7 + $0x2d8] ss:$72 sps:$4 sm:$0xff]   ;;  %v3702_v38 = vld [vmem:[#allocation7 + $0x94] ss:$72 sps:$4 sm:$0xff]   ;;  %v320_v7 = vlaneseq }
  0x72   : > { %1825 = vmatprep.subr.bf16.mxu1 %v3678_v20  ;;  %v3659_v33 = vld [vmem:[%s4288_s8 + $0x8] sm:$0xff]   ;;  %v3704_v39 = vld [vmem:[#allocation7 + $0x90] ss:$72 sps:$4 sm:$0xff]   ;;  %v3662_v49 = vld [vmem:[%s4288_s8 + $0x20] sm:$0xff]   ;;  %vm1766_vm0 = vcmask 1042432   ;;  %vm1741_vm1 = vcmask 179200  }
  0x73   : > { %v3683_v34 = vld [vmem:[#allocation7 + $0x2dc] ss:$72 sps:$4 sm:$0xff]   ;;  %v3698_v36 = vld [vmem:[#allocation7 + $0x120] ss:$72 sps:$4 sm:$0xff]   ;;  %v3660_v42 = vld [vmem:[%s4288_s8 + $0x10] sm:$0xff]   ;;  %s3549_s17 = smul.u32 36864, %s4170_s22 }
  0x74   : > { %465 = vmatpush1.bf16.msra.mxu0 %v3645_v8  ;;  %v3687_v40 = vld [vmem:[#allocation7 + $0x248] ss:$72 sps:$4 sm:$0xff]   ;;  %v3695_v41 = vld [vmem:[#allocation7 + $0x1bc] ss:$72 sps:$4 sm:$0xff]   ;;  %v3693_v43 = vld [vmem:[#allocation7 + $0x1b8] ss:$72 sps:$4 sm:$0xff]  }
  0x75   : > { %466 = vmatprep.subr.bf16.mxu0 %v3646_v9  ;;  %1826 = vmatpush1.bf16.msra.mxu1 %v3680_v21  ;;  %v3701_v44 = vld [vmem:[#allocation7 + $0x12c] ss:$72 sps:$4 sm:$0xff]   ;;  %v3699_v45 = vld [vmem:[#allocation7 + $0x128] ss:$72 sps:$4 sm:$0xff]   ;;  %v3707_v46 = vld [vmem:[#allocation7 + $0x9c] ss:$72 sps:$4 sm:$0xff]   ;;  %s5351_s14 = scalar_lea.hbm %s5404_s5, %s3549_s17 }
  0x76   : > { %1827 = vmatprep.subr.bf16.mxu1 %v3684_v23  ;;  %v3661_v47 = vld [vmem:[%s4288_s8 + $0x18] sm:$0xff]   ;;  %v3663_v50 = vld [vmem:[%s4288_s8 + $0x28] sm:$0xff]   ;;  %v3664_v51 = vld [vmem:[%s4288_s8 + $0x30] sm:$0xff]   ;;  %v4370_v8 = vshrl.u32 %v320_v7, 7  ;;  %s3127_s22 = scalar_lea.sflag [#allocation4], %s4284_s29  ;;  %p5422_p12 = scmp.ne.s32.totalorder %s5414_s7, 0 }
  0x77   : > { %v3705_v48 = vld [vmem:[#allocation7 + $0x98] ss:$72 sps:$4 sm:$0xff]   ;;  %v3708_v53 = vld [vmem:[#allocation7 + $0x4] ss:$72 sps:$4 sm:$0xff]   ;;  %v3711_v56 = vld [vmem:[#allocation7 + $0x8] ss:$72 sps:$4 sm:$0xff]  }
  0x78   : > { %467 = vmatpush1.bf16.msra.mxu0 %v3648_v10  ;;  %v3665_v52 = vld [vmem:[%s4288_s8 + $0x38] sm:$0xff]   ;;  %v3710_v55 = vld [vmem:[#allocation7] ss:$72 sps:$4 sm:$0xff]   ;;  %v3718_v1 = vld [vmem:[#allocation7 + $0x484] ss:$72 sps:$4 sm:$0xff]   ;;  %v4373_v9 = vsub.s32 1, %v4370_v8 }
  0x79   : > { %468 = vmatprep.subr.bf16.mxu0 %v3649_v11  ;;  %1828 = vmatpush1.bf16.msra.mxu1 %v3686_v26  ;;  %v3713_v54 = vld [vmem:[#allocation7 + $0xc] ss:$72 sps:$4 sm:$0xff]   ;;  %v782_v58 = vld [vmem:[#allocation7 + $0x518] sm:$0x77]  ;;  %v3720_v3 = vld [vmem:[#allocation7 + $0x480] ss:$72 sps:$4 sm:$0xff]  }
  0x7a   : > { %1829 = vmatprep.subr.bf16.mxu1 %v3690_v29  ;;  %v781_v57 = vld [vmem:[#allocation7 + $0x510] sm:$0x77]  ;;  %v3446_v61 = vcombine.high %v782_v58, %v782_v58  ;;  %v3445_v62 = vcombine.low %v782_v58, %v782_v58  ;;  %v3726_v5 = vld [vmem:[#allocation7 + $0x404] ss:$72 sps:$4 sm:$0xff]   ;;  %v4376_v10 = vsub.s32 0, %v4370_v8  ;;  %s3548_s8 = smul.u32 2304, %s4284_s29 }
  0x7b   : > { %v3444_v59 = vcombine.high %v781_v57, %v781_v57  ;;  %v3443_v60 = vcombine.low %v781_v57, %v781_v57  ;;  %v3723_v2 = vld [vmem:[#allocation7 + $0x48c] ss:$72 sps:$4 sm:$0xff]   ;;  %v3721_v4 = vld [vmem:[#allocation7 + $0x488] ss:$72 sps:$4 sm:$0xff]   ;;  %v318_v11 = vld [vmem:[#allocation5] sm:$0x3] }
  0x7c   : > { %469 = vmatpush1.bf16.msra.mxu0 %v3651_v12  ;;  %v3738_v6 = vld [vmem:[#allocation7 + $0x40c] ss:$72 sps:$4 sm:$0xff]   ;;  %v4379_v13 = vrot.slane %v318_v11, %v4373_v9  ;;  %v4382_v14 = vrot.slane %v318_v11, %v4376_v10  ;;  %v3724_v29 = vld [vmem:[#allocation7 + $0x400] ss:$72 sps:$4 sm:$0xff]   ;;  %s4639_s16 = scalar_lea.vmem [#allocation10], %s3548_s8  ;;  %s4116_s27 = smov [#allocation10]  }
  0x7d   : > { %470 = vmatprep.subr.bf16.mxu0 %v3652_v15  ;;  %1830 = vmatpush1.bf16.msra.mxu1 %v3692_v30  ;;  %v1768_v63 = vsel %vm1766_vm0, %v3443_v60, 0  ;;  %v3736_v30 = vld [vmem:[#allocation7 + $0x408] ss:$72 sps:$4 sm:$0xff]   ;;  %s3141_s9 = sshll.u32 %s4639_s16, 4  ;;  %s4037_s30 = sshll.u32 %s4116_s27, 4  ;;  %s5353_s9 = int_to_ptr.vmem [resolvable:$true] %s3141_s9  ;;  %s4038_s30 = int_to_ptr.vmem [resolvable:$false] %s4037_s30 }
  0x7e   : > { %1831 = vmatprep.subr.bf16.mxu1 %v3696_v32  ;;  %s4033_s23 = scalar_lea.vmem %s5353_s9, 36864  ;;  %s4039_s10 = scalar_lea.vmem %s4038_s30, 73728 }
  0x7f   : > { %p4034_p8 = scmp.ne.s32.totalorder %s5353_s9, %s4033_s23  ;;  %p4040_p13 = scmp.lt.s32.totalorder %s5353_s9, %s4038_s30 }
  0x80   : > { %471 = vmatpush1.bf16.msra.mxu0 %v3654_v18  ;;  %p4041_p0 = scmp.lt.s32.totalorder %s4039_s10, %s4033_s23 }
  0x81   : > { %472 = vmatprep.subr.bf16.mxu0 %v3655_v19  ;;  %1832 = vmatpush1.bf16.msra.mxu1 %v3698_v36  ;;  %p4035_p7 = pnand %p4034_p8, %p5422_p12 }
  0x82   : > { %1833 = vmatprep.subr.bf16.mxu1 %v3702_v38  ;;  %p4042_p1 = por %p4041_p0, %p4040_p13 }
  0x83   : > { %p4036_p10 = pneg %p4035_p7 }
  0x84   : > { %473 = vmatpush1.bf16.msra.mxu0 %v3657_v22 }
  0x85   : > { %1934 = vmatprep.subr.bf16.mxu0 %v3671_v24  ;;  %1834 = vmatpush1.bf16.msra.mxu1 %v3704_v39  ;;  %p4043_p3 = pnand %p4042_p1, %p4036_p10 }
  0x86   : > { %1835 = vmatprep.subr.bf16.mxu1 %v3708_v53 }
  0x87   : > { %491 = vmatmul.mubr.bf16.vlgmr.msra.gmra.mxu0 %v3658_v25 }
  0x88   : > { %500 = vmatprep.mubr.bf16.mxu0 %v4115_v0  ;;  %1935 = vmatpush1.bf16.msra.mxu0 %v3669_v27 }
  0x89   : > { %1936 = vmatprep.subr.bf16.mxu0 %v3677_v28  ;;  %1836 = vmatpush1.bf16.msra.mxu1 %v3710_v55  ;;  %v3735_v55 = vld [vmem:[#allocation7 + $0x254] ss:$72 sps:$4 sm:$0xff]  }
  0x8a   : > { %3461 = vmatprep.subr.msk.bf16.mxu1 %vm1766_vm0, %v3444_v59 }
  0x8c   : > { %1937 = vmatpush1.bf16.msra.mxu0 %v3675_v31 }
  0x8d   : > { %1938 = vmatprep.subr.bf16.mxu0 %v3683_v34  ;;  %1850 = vmatpush2.bf16.msra.mxu1 %v1768_v63  ;;  %v3744_v34 = vld [vmem:[#allocation7 + $0x37c] ss:$72 sps:$4 sm:$0xff]   ;;  %v3751_v63 = vld [vmem:[#allocation7 + $0x258] ss:$72 sps:$4 sm:$0xff]  }
  0x8e   : > { %1851 = vmatprep.subr.bf16.mxu1 %v3718_v1 }
  0x8f   : > { %501 = vmatmul.mubr.bf16.gmra.mxu0 %v3659_v33  ;;  %v3729_v33 = vld [vmem:[#allocation7 + $0x374] ss:$72 sps:$4 sm:$0xff]  }
  0x90   : > { %510 = vmatprep.mubr.bf16.mxu0 %v4115_v0  ;;  %1939 = vmatpush1.bf16.msra.mxu0 %v3681_v35 }
  0x91   : > { %1940 = vmatprep.subr.bf16.mxu0 %v3689_v37  ;;  %1852 = vmatpush2.bf16.msra.mxu1 %v3720_v3  ;;  %v3759_v3 = vld [vmem:[#allocation7 + $0x1cc] ss:$72 sps:$4 sm:$0xff]  }
  0x92   : > { %2047 = vmatprep.subr.bf16.mxu1 %v3726_v5 }
  0x94   : > { %1941 = vmatpush1.bf16.msra.mxu0 %v3687_v40  ;;  %v3727_v40 = vld [vmem:[#allocation7 + $0x370] ss:$72 sps:$4 sm:$0xff]  }
  0x95   : > { %1942 = vmatprep.subr.bf16.mxu0 %v3695_v41  ;;  %v3742_v41 = vld [vmem:[#allocation7 + $0x378] ss:$72 sps:$4 sm:$0xff]  }
  0x97   : > { %511 = vmatmul.mubr.bf16.gmra.mxu0 %v3660_v42 }
  0x98   : > { %520 = vmatprep.mubr.bf16.mxu0 %v4115_v0  ;;  %1943 = vmatpush1.bf16.msra.mxu0 %v3693_v43 }
  0x99   : > { %1944 = vmatprep.subr.bf16.mxu0 %v3701_v44  ;;  %v3732_v44 = vld [vmem:[#allocation7 + $0x2e4] ss:$72 sps:$4 sm:$0xff]  }
  0x9c   : > { %1945 = vmatpush1.bf16.msra.mxu0 %v3699_v45  ;;  %v3750_v45 = vld [vmem:[#allocation7 + $0x2ec] ss:$72 sps:$4 sm:$0xff]  }
  0x9d   : > { %1946 = vmatprep.subr.bf16.mxu0 %v3707_v46 }
  0x9f   : > { %521 = vmatmul.mubr.bf16.gmra.mxu0 %v3661_v47 }
  0xa0   : > { %530 = vmatprep.mubr.bf16.mxu0 %v4115_v0  ;;  %1947 = vmatpush1.bf16.msra.mxu0 %v3705_v48 }
  0xa1   : > { %1948 = vmatprep.subr.bf16.mxu0 %v3713_v54 }
  0xa4   : > { %1949 = vmatpush1.bf16.msra.mxu0 %v3711_v56  ;;  %v3753_v56 = vld [vmem:[#allocation7 + $0x25c] ss:$72 sps:$4 sm:$0xff]  }
  0xa5   : > { %3470 = vmatprep.subr.msk.bf16.mxu0 %vm1766_vm0, %v3446_v61 }
  0xa7   : > { %531 = vmatmul.mubr.bf16.gmra.mxu0 %v3662_v49 }
  0xa8   : > { %540 = vmatprep.mubr.bf16.mxu0 %v4115_v0 }
  0xaf   : > { %541 = vmatmul.mubr.bf16.gmra.mxu0 %v3663_v50 }
  0xb0   : > { %550 = vmatprep.mubr.bf16.mxu0 %v4115_v0 }
  0xb7   : > { %551 = vmatmul.mubr.bf16.gmra.mxu0 %v3664_v51  ;;  %v3730_v51 = vld [vmem:[#allocation7 + $0x2e0] ss:$72 sps:$4 sm:$0xff]  }
  0xb8   : > { %560 = vmatprep.mubr.bf16.mxu0 %v4115_v0  ;;  %v1774_v0 = vsel %vm1766_vm0, %v3445_v62, 0  ;;  %v3733_v62 = vld [vmem:[#allocation7 + $0x250] ss:$72 sps:$4 sm:$0xff]  }
  0xb9   : > { %1963 = vmatpush2.bf16.msra.mxu0 %v1774_v0 }
  0xba   : > { %1964 = vmatprep.subr.bf16.mxu0 %v3723_v2  ;;  %v3741_v2 = vld [vmem:[#allocation7 + $0x1c4] ss:$72 sps:$4 sm:$0xff]  }
  0xbd   : > { %1965 = vmatpush2.bf16.msra.mxu0 %v3721_v4 }
  0xbe   : > { %2160 = vmatprep.subr.bf16.mxu0 %v3738_v6 }
  0xbf   : > { %561 = vmatmul.mubr.bf16.gmra.mxu0 %v3665_v52  ;;  %v3748_v52 = vld [vmem:[#allocation7 + $0x2e8] ss:$72 sps:$4 sm:$0xff]  }
 0x147   : > { %v492_v12 = vpop.f32.mrf.mxu0 }
 0x148   : > { %v493_v19 = vadd.f32 %v492_v12, %v4382_v14  ;;  %v3739_v12 = vld [vmem:[#allocation7 + $0x1c0] ss:$72 sps:$4 sm:$0xff]  }
 0x149   : > { %v494_v15 = vpop.f32.mrf.mxu0 }
 0x14a   : > { %v495_v17 = vadd.f32 %v494_v15, %v4379_v13  ;;  %v571_v26 = vmax.f32 %v493_v19, 0.0  ;;  %v3757_v15 = vld [vmem:[#allocation7 + $0x1c8] ss:$72 sps:$4 sm:$0xff]   ;;  %v3765_v19 = vld [vmem:[#allocation7 + $0x13c] ss:$72 sps:$4 sm:$0xff]  }
 0x14b   : > { %v496_v16 = vpop.f32.mrf.mxu0 }
 0x14c   : > { %v497_v18 = vadd.f32 %v496_v16, %v4382_v14  ;;  %v572_v24 = vmax.f32 %v495_v17, 0.0 }
 0x14d   : > { %v498_v20 = vpop.f32.mrf.mxu0 }
 0x14e   : > { %v499_v21 = vadd.f32 %v498_v20, %v4379_v13  ;;  %v573_v22 = vmax.f32 %v497_v18, 0.0  ;;  %v3747_v18 = vld [vmem:[#allocation7 + $0x134] ss:$72 sps:$4 sm:$0xff]  }
 0x14f   : > { %v502_v23 = vpop.f32.mrf.mxu0 }
 0x150   : > { %v574_v25 = vmax.f32 %v499_v21, 0.0  ;;  %v4390_v31 = vpack.c.bf16 %v573_v22, %v571_v26  ;;  %v503_v37 = vadd.f32 %v502_v23, %v4382_v14  ;;  %v3763_v26 = vld [vmem:[#allocation7 + $0x138] ss:$72 sps:$4 sm:$0xff]  }
 0x151   : > { %v504_v27 = vpop.f32.mrf.mxu0 }
 0x152   : > { %v4388_v28 = vpack.c.bf16 %v574_v25, %v572_v24  ;;  %v505_v35 = vadd.f32 %v504_v27, %v4379_v13  ;;  %v575_v48 = vmax.f32 %v503_v37, 0.0  ;;  %v3745_v25 = vld [vmem:[#allocation7 + $0x130] ss:$72 sps:$4 sm:$0xff]  }
 0x153   : > { %v506_v32 = vpop.f32.mrf.mxu0 }
 0x154   : > { %v507_v36 = vadd.f32 %v506_v32, %v4382_v14  ;;  %3462 = vmatprep.mubr.msk.bf16.mxu1 %vm1741_vm1, %v4388_v28  ;;  %3471 = vmatprep.mubr.msk.bf16.mxu0 %vm1741_vm1, %v4388_v28  ;;  %v576_v46 = vmax.f32 %v505_v35, 0.0  ;;  %v3768_v32 = vld [vmem:[#allocation7 + $0xac] ss:$72 sps:$4 sm:$0xff]  }
 0x155   : > { %v508_v38 = vpop.f32.mrf.mxu0  ;;  %1854 = vmatmul.mubr.bf16.vlgmr.msra.gmra.mxu1 %v4390_v31  ;;  %1967 = vmatmul.mubr.bf16.vlgmr.msra.gmra.mxu0 %v4390_v31 }
 0x156   : > { %v509_v39 = vadd.f32 %v508_v38, %v4379_v13  ;;  %2048 = vmatpush1.bf16.msra.mxu1 %v3724_v29  ;;  %2161 = vmatpush1.bf16.msra.mxu0 %v3736_v30  ;;  %v577_v42 = vmax.f32 %v507_v36, 0.0  ;;  %v3756_v30 = vld [vmem:[#allocation7 + $0xa4] ss:$72 sps:$4 sm:$0xff]   ;;  %v3754_v38 = vld [vmem:[#allocation7 + $0xa0] ss:$72 sps:$4 sm:$0xff]  }
 0x157   : > { %v512_v43 = vpop.f32.mrf.mxu0  ;;  %2049 = vmatprep.subr.bf16.mxu1 %v3729_v33  ;;  %2162 = vmatprep.subr.bf16.mxu0 %v3744_v34 }
 0x158   : > { %v578_v47 = vmax.f32 %v509_v39, 0.0  ;;  %v4404_v53 = vpack.c.bf16 %v577_v42, %v575_v48  ;;  %v513_v59 = vadd.f32 %v512_v43, %v4382_v14  ;;  %v3766_v39 = vld [vmem:[#allocation7 + $0xa8] ss:$72 sps:$4 sm:$0xff]   ;;  %v3762_v42 = vld [vmem:[#allocation7 + $0x14] ss:$72 sps:$4 sm:$0xff]  }
 0x159   : > { %v514_v49 = vpop.f32.mrf.mxu0  ;;  %v783_v43 = vld [vmem:[#allocation7 + $0x520] sm:$0x77] }
 0x15a   : > { %v4402_v50 = vpack.c.bf16 %v578_v47, %v576_v46  ;;  %2050 = vmatpush1.bf16.msra.mxu1 %v3727_v40  ;;  %2163 = vmatpush1.bf16.msra.mxu0 %v3742_v41  ;;  %v515_v57 = vadd.f32 %v514_v49, %v4379_v13  ;;  %v579_v6 = vmax.f32 %v513_v59, 0.0  ;;  %v784_v47 = vld [vmem:[#allocation7 + $0x528] sm:$0x77] }
 0x15b   : > { %v516_v54 = vpop.f32.mrf.mxu0  ;;  %2051 = vmatprep.subr.bf16.mxu1 %v3732_v44  ;;  %2164 = vmatprep.subr.bf16.mxu0 %v3750_v45  ;;  %v3773_v44 = vld [vmem:[#allocation7 + $0x1c] ss:$72 sps:$4 sm:$0xff]   ;;  %v3450_v59 = vcombine.high %v784_v47, %v784_v47 }
 0x15c   : > { %v517_v58 = vadd.f32 %v516_v54, %v4382_v14  ;;  %3463 = vmatprep.mubr.msk.bf16.mxu1 %vm1741_vm1, %v4402_v50  ;;  %3472 = vmatprep.mubr.msk.bf16.mxu0 %vm1741_vm1, %v4402_v50  ;;  %v580_v4 = vmax.f32 %v515_v57, 0.0  ;;  %v3448_v54 = vcombine.high %v783_v43, %v783_v43 }
 0x15d   : > { %v518_v60 = vpop.f32.mrf.mxu0  ;;  %1864 = vmatmul.mubr.bf16.gmra.mxu1 %v4404_v53  ;;  %1977 = vmatmul.mubr.bf16.gmra.mxu0 %v4404_v53 }
 0x15e   : > { %v519_v61 = vadd.f32 %v518_v60, %v4379_v13  ;;  %2052 = vmatpush1.bf16.msra.mxu1 %v3730_v51  ;;  %2165 = vmatpush1.bf16.msra.mxu0 %v3748_v52  ;;  %v581_v0 = vmax.f32 %v517_v58, 0.0  ;;  %v3760_v52 = vld [vmem:[#allocation7 + $0x10] ss:$72 sps:$4 sm:$0xff]   ;;  %v3447_v58 = vcombine.low %v783_v43, %v783_v43  ;;  %v3449_v60 = vcombine.low %v784_v47, %v784_v47 }
 0x15f   : > { %v522_v1 = vpop.f32.mrf.mxu0  ;;  %2053 = vmatprep.subr.bf16.mxu1 %v3735_v55  ;;  %2166 = vmatprep.subr.bf16.mxu0 %v3753_v56  ;;  %v3771_v55 = vld [vmem:[#allocation7 + $0x18] ss:$72 sps:$4 sm:$0xff]  }
 0x160   : > { %v582_v5 = vmax.f32 %v519_v61, 0.0  ;;  %v4418_v16 = vpack.c.bf16 %v581_v0, %v579_v6  ;;  %v523_v22 = vadd.f32 %v522_v1, %v4382_v14  ;;  %v1786_v6 = vsel %vm1766_vm0, %v3449_v60, 0 }
 0x161   : > { %v524_v7 = vpop.f32.mrf.mxu0 }
 0x162   : > { %v4416_v11 = vpack.c.bf16 %v582_v5, %v580_v4  ;;  %2054 = vmatpush1.bf16.msra.mxu1 %v3733_v62  ;;  %2167 = vmatpush1.bf16.msra.mxu0 %v3751_v63  ;;  %v525_v20 = vadd.f32 %v524_v7, %v4379_v13  ;;  %v583_v35 = vmax.f32 %v523_v22, 0.0  ;;  %v1780_v4 = vsel %vm1766_vm0, %v3447_v58, 0  ;;  %v3777_v5 = vld [vmem:[#allocation7 + $0x494] ss:$72 sps:$4 sm:$0xff]  }
 0x163   : > { %v526_v17 = vpop.f32.mrf.mxu0  ;;  %2055 = vmatprep.subr.bf16.mxu1 %v3741_v2  ;;  %2168 = vmatprep.subr.bf16.mxu0 %v3759_v3  ;;  %v3781_v7 = vld [vmem:[#allocation7 + $0x49c] ss:$72 sps:$4 sm:$0xff]  }
 0x164   : > { %v527_v21 = vadd.f32 %v526_v17, %v4382_v14  ;;  %3464 = vmatprep.mubr.msk.bf16.mxu1 %vm1741_vm1, %v4416_v11  ;;  %3473 = vmatprep.mubr.msk.bf16.mxu0 %vm1741_vm1, %v4416_v11  ;;  %v584_v33 = vmax.f32 %v525_v20, 0.0  ;;  %v3775_v20 = vld [vmem:[#allocation7 + $0x490] ss:$72 sps:$4 sm:$0xff]  }
 0x165   : > { %v528_v23 = vpop.f32.mrf.mxu0  ;;  %1874 = vmatmul.mubr.bf16.gmra.mxu1 %v4418_v16  ;;  %1987 = vmatmul.mubr.bf16.gmra.mxu0 %v4418_v16 }
 0x166   : > { %v529_v24 = vadd.f32 %v528_v23, %v4379_v13  ;;  %2056 = vmatpush1.bf16.msra.mxu1 %v3739_v12  ;;  %2169 = vmatpush1.bf16.msra.mxu0 %v3757_v15  ;;  %v585_v27 = vmax.f32 %v527_v21, 0.0  ;;  %v3779_v21 = vld [vmem:[#allocation7 + $0x498] ss:$72 sps:$4 sm:$0xff]  }
 0x167   : > { %v532_v29 = vpop.f32.mrf.mxu0  ;;  %2057 = vmatprep.subr.bf16.mxu1 %v3747_v18  ;;  %2170 = vmatprep.subr.bf16.mxu0 %v3765_v19 }
 0x168   : > { %v586_v34 = vmax.f32 %v529_v24, 0.0  ;;  %v4432_v40 = vpack.c.bf16 %v585_v27, %v583_v35  ;;  %v533_v48 = vadd.f32 %v532_v29, %v4382_v14  ;;  %v3784_v24 = vld [vmem:[#allocation7 + $0x414] ss:$72 sps:$4 sm:$0xff]  }
 0x169   : > { %v534_v36 = vpop.f32.mrf.mxu0 }
 0x16a   : > { %v4430_v37 = vpack.c.bf16 %v586_v34, %v584_v33  ;;  %2058 = vmatpush1.bf16.msra.mxu1 %v3745_v25  ;;  %2171 = vmatpush1.bf16.msra.mxu0 %v3763_v26  ;;  %v535_v45 = vadd.f32 %v534_v36, %v4379_v13  ;;  %v587_v63 = vmax.f32 %v533_v48, 0.0  ;;  %v3796_v25 = vld [vmem:[#allocation7 + $0x41c] ss:$72 sps:$4 sm:$0xff]  }
 0x16b   : > { %v536_v41 = vpop.f32.mrf.mxu0  ;;  %2059 = vmatprep.subr.bf16.mxu1 %v3756_v30  ;;  %2172 = vmatprep.subr.bf16.mxu0 %v3768_v32 }
 0x16c   : > { %v537_v46 = vadd.f32 %v536_v41, %v4382_v14  ;;  %3465 = vmatprep.mubr.msk.bf16.mxu1 %vm1741_vm1, %v4430_v37  ;;  %3474 = vmatprep.mubr.msk.bf16.mxu0 %vm1741_vm1, %v4430_v37  ;;  %v588_v61 = vmax.f32 %v535_v45, 0.0 }
 0x16d   : > { %v538_v49 = vpop.f32.mrf.mxu0  ;;  %1884 = vmatmul.mubr.bf16.gmra.mxu1 %v4432_v40  ;;  %1997 = vmatmul.mubr.bf16.gmra.mxu0 %v4432_v40 }
 0x16e   : > { %v539_v51 = vadd.f32 %v538_v49, %v4379_v13  ;;  %2060 = vmatpush1.bf16.msra.mxu1 %v3754_v38  ;;  %2173 = vmatpush1.bf16.msra.mxu0 %v3766_v39  ;;  %v589_v56 = vmax.f32 %v537_v46, 0.0 }
 0x16f   : > { %v542_v57 = vpop.f32.mrf.mxu0  ;;  %2061 = vmatprep.subr.bf16.mxu1 %v3762_v42  ;;  %2174 = vmatprep.subr.bf16.mxu0 %v3773_v44 }
 0x170   : > { %v590_v62 = vmax.f32 %v539_v51, 0.0  ;;  %v4446_v2 = vpack.c.bf16 %v589_v56, %v587_v63  ;;  %v543_v17 = vadd.f32 %v542_v57, %v4382_v14 }
 0x171   : > { %v544_v0 = vpop.f32.mrf.mxu0 }
 0x172   : > { %v4444_v1 = vpack.c.bf16 %v590_v62, %v588_v61  ;;  %2062 = vmatpush1.bf16.msra.mxu1 %v3760_v52  ;;  %2175 = vmatpush1.bf16.msra.mxu0 %v3771_v55  ;;  %v545_v12 = vadd.f32 %v544_v0, %v4379_v13  ;;  %v591_v29 = vmax.f32 %v543_v17, 0.0  ;;  %v3794_v0 = vld [vmem:[#allocation7 + $0x418] ss:$72 sps:$4 sm:$0xff]  }
 0x173   : > { %v546_v3 = vpop.f32.mrf.mxu0  ;;  %3479 = vmatprep.subr.msk.bf16.mxu1 %vm1766_vm0, %v3448_v54  ;;  %3488 = vmatprep.subr.msk.bf16.mxu0 %vm1766_vm0, %v3450_v59  ;;  %v3806_v17 = vld [vmem:[#allocation7 + $0x2f8] ss:$72 sps:$4 sm:$0xff]  }
 0x174   : > { %v547_v15 = vadd.f32 %v546_v3, %v4382_v14  ;;  %3466 = vmatprep.mubr.msk.bf16.mxu1 %vm1741_vm1, %v4444_v1  ;;  %3475 = vmatprep.mubr.msk.bf16.mxu0 %vm1741_vm1, %v4444_v1  ;;  %v592_v26 = vmax.f32 %v545_v12, 0.0  ;;  %v3802_v3 = vld [vmem:[#allocation7 + $0x38c] ss:$72 sps:$4 sm:$0xff]   ;;  %v3808_v12 = vld [vmem:[#allocation7 + $0x2fc] ss:$72 sps:$4 sm:$0xff]  }
 0x175   : > { %v548_v18 = vpop.f32.mrf.mxu0  ;;  %1894 = vmatmul.mubr.bf16.gmra.mxu1 %v4446_v2  ;;  %2007 = vmatmul.mubr.bf16.gmra.mxu0 %v4446_v2 }
 0x176   : > { %v549_v19 = vadd.f32 %v548_v18, %v4379_v13  ;;  %2076 = vmatpush2.bf16.msra.mxu1 %v1780_v4  ;;  %2189 = vmatpush2.bf16.msra.mxu0 %v1786_v6  ;;  %v593_v22 = vmax.f32 %v547_v15, 0.0  ;;  %v3785_v4 = vld [vmem:[#allocation7 + $0x380] ss:$72 sps:$4 sm:$0xff]   ;;  %v3793_v15 = vld [vmem:[#allocation7 + $0x264] ss:$72 sps:$4 sm:$0xff]  }
 0x177   : > { %v552_v23 = vpop.f32.mrf.mxu0  ;;  %2077 = vmatprep.subr.bf16.mxu1 %v3777_v5  ;;  %2190 = vmatprep.subr.bf16.mxu0 %v3781_v7  ;;  %v3790_v5 = vld [vmem:[#allocation7 + $0x2f4] ss:$72 sps:$4 sm:$0xff]   ;;  %v3800_v6 = vld [vmem:[#allocation7 + $0x388] ss:$72 sps:$4 sm:$0xff]  }
 0x178   : > { %v594_v27 = vmax.f32 %v549_v19, 0.0  ;;  %v4464_v33 = vpack.c.bf16 %v593_v22, %v591_v29  ;;  %v553_v38 = vadd.f32 %v552_v23, %v4382_v14  ;;  %v3788_v7 = vld [vmem:[#allocation7 + $0x2f0] ss:$72 sps:$4 sm:$0xff]   ;;  %v3811_v18 = vld [vmem:[#allocation7 + $0x26c] ss:$72 sps:$4 sm:$0xff]  }
 0x179   : > { %v554_v30 = vpop.f32.mrf.mxu0  ;;  %v3791_v19 = vld [vmem:[#allocation7 + $0x260] ss:$72 sps:$4 sm:$0xff]   ;;  %v3797_v22 = vld [vmem:[#allocation7 + $0x1d0] ss:$72 sps:$4 sm:$0xff]   ;;  %v3817_v23 = vld [vmem:[#allocation7 + $0x1dc] ss:$72 sps:$4 sm:$0xff]  }
 0x17a   : > { %v4462_v32 = vpack.c.bf16 %v594_v27, %v592_v26  ;;  %2078 = vmatpush2.bf16.msra.mxu1 %v3775_v20  ;;  %2191 = vmatpush2.bf16.msra.mxu0 %v3779_v21  ;;  %v555_v35 = vadd.f32 %v554_v30, %v4379_v13  ;;  %v595_v46 = vmax.f32 %v553_v38, 0.0  ;;  %v3799_v20 = vld [vmem:[#allocation7 + $0x1d4] ss:$72 sps:$4 sm:$0xff]   ;;  %v3809_v21 = vld [vmem:[#allocation7 + $0x268] ss:$72 sps:$4 sm:$0xff]  }
 0x17b   : > { %v556_v34 = vpop.f32.mrf.mxu0  ;;  %2273 = vmatprep.subr.bf16.mxu1 %v3784_v24  ;;  %2386 = vmatprep.subr.bf16.mxu0 %v3796_v25  ;;  %v3805_v24 = vld [vmem:[#allocation7 + $0x144] ss:$72 sps:$4 sm:$0xff]   ;;  %v3815_v25 = vld [vmem:[#allocation7 + $0x1d8] ss:$72 sps:$4 sm:$0xff]   ;;  %v3814_v29 = vld [vmem:[#allocation7 + $0xb4] ss:$72 sps:$4 sm:$0xff]  }
 0x17c   : > { %v557_v36 = vadd.f32 %v556_v34, %v4382_v14  ;;  %3467 = vmatprep.mubr.msk.bf16.mxu1 %vm1741_vm1, %v4462_v32  ;;  %3476 = vmatprep.mubr.msk.bf16.mxu0 %vm1741_vm1, %v4462_v32  ;;  %v596_v44 = vmax.f32 %v555_v35, 0.0  ;;  %v3823_v26 = vld [vmem:[#allocation7 + $0x14c] ss:$72 sps:$4 sm:$0xff]   ;;  %v3803_v27 = vld [vmem:[#allocation7 + $0x140] ss:$72 sps:$4 sm:$0xff]  }
 0x17d   : > { %v558_v39 = vpop.f32.mrf.mxu0  ;;  %1904 = vmatmul.mubr.bf16.gmra.mxu1 %v4464_v33  ;;  %2017 = vmatmul.mubr.bf16.gmra.mxu0 %v4464_v33  ;;  %v3821_v30 = vld [vmem:[#allocation7 + $0x148] ss:$72 sps:$4 sm:$0xff]   ;;  %v3826_v35 = vld [vmem:[#allocation7 + $0xbc] ss:$72 sps:$4 sm:$0xff]   ;;  %v3824_v38 = vld [vmem:[#allocation7 + $0xb8] ss:$72 sps:$4 sm:$0xff]  }
 0x17e   : > { %v559_v41 = vadd.f32 %v558_v39, %v4379_v13  ;;  %v597_v42 = vmax.f32 %v557_v36, 0.0  ;;  %v3812_v34 = vld [vmem:[#allocation7 + $0xb0] ss:$72 sps:$4 sm:$0xff]   ;;  %v3820_v36 = vld [vmem:[#allocation7 + $0x24] ss:$72 sps:$4 sm:$0xff]  }
 0x17f   : > { %v562_v43 = vpop.f32.mrf.mxu0  ;;  %v785_v39 = vld [vmem:[#allocation7 + $0x530] sm:$0x77] }
 0x180   : > { %v598_v45 = vmax.f32 %v559_v41, 0.0  ;;  %v4478_v49 = vpack.c.bf16 %v597_v42, %v595_v46  ;;  %v563_v55 = vadd.f32 %v562_v43, %v4382_v14  ;;  %v3831_v41 = vld [vmem:[#allocation7 + $0x2c] ss:$72 sps:$4 sm:$0xff]   ;;  %v786_v42 = vld [vmem:[#allocation7 + $0x538] sm:$0x77] }
 0x181   : > { %v564_v47 = vpop.f32.mrf.mxu0  ;;  %v3818_v43 = vld [vmem:[#allocation7 + $0x20] ss:$72 sps:$4 sm:$0xff]  }
 0x182   : > { %v4476_v48 = vpack.c.bf16 %v598_v45, %v596_v44  ;;  %v565_v52 = vadd.f32 %v564_v47, %v4379_v13  ;;  %v599_v61 = vmax.f32 %v563_v55, 0.0  ;;  %v3452_v44 = vcombine.high %v785_v39, %v785_v39  ;;  %v3829_v46 = vld [vmem:[#allocation7 + $0x28] ss:$72 sps:$4 sm:$0xff]  }
 0x183   : > { %v566_v51 = vpop.f32.mrf.mxu0  ;;  %v3451_v45 = vcombine.low %v785_v39, %v785_v39  ;;  %v3453_v47 = vcombine.low %v786_v42, %v786_v42  ;;  %v3889_v39 = vld [vmem:[#allocation7 + $0x3c] ss:$72 sps:$4 sm:$0xff]  }
 0x184   : > { %v567_v54 = vadd.f32 %v566_v51, %v4382_v14  ;;  %3468 = vmatprep.mubr.msk.bf16.mxu1 %vm1741_vm1, %v4476_v48  ;;  %3477 = vmatprep.mubr.msk.bf16.mxu0 %vm1741_vm1, %v4476_v48  ;;  %v600_v59 = vmax.f32 %v565_v52, 0.0  ;;  %v3787_v14 = vld [vmem:[#allocation7 + $0x384] ss:$72 sps:$4 sm:$0xff]   ;;  %v3454_v51 = vcombine.high %v786_v42, %v786_v42  ;;  %v3876_v42 = vld [vmem:[#allocation7 + $0x30] ss:$72 sps:$4 sm:$0xff]  }
 0x185   : > { %v568_v56 = vpop.f32.mrf.mxu0  ;;  %1914 = vmatmul.mubr.bf16.gmra.mxu1 %v4478_v49  ;;  %2027 = vmatmul.mubr.bf16.gmra.mxu0 %v4478_v49  ;;  %v1792_v52 = vsel %vm1766_vm0, %v3451_v45, 0  ;;  %v1798_v55 = vsel %vm1766_vm0, %v3453_v47, 0  ;;  %v3887_v45 = vld [vmem:[#allocation7 + $0x38] ss:$72 sps:$4 sm:$0xff]  }
 0x186   : > { %v569_v57 = vadd.f32 %v568_v56, %v4379_v13  ;;  %v601_v58 = vmax.f32 %v567_v54, 0.0  ;;  %v3782_v13 = vld [vmem:[#allocation7 + $0x410] ss:$72 sps:$4 sm:$0xff]   ;;  %v3835_v54 = vld [vmem:[#allocation7 + $0x4a4] ss:$72 sps:$4 sm:$0xff]  }
 0x187   : > { %v3839_v56 = vld [vmem:[#allocation7 + $0x4ac] ss:$72 sps:$4 sm:$0xff]  }
 0x188   : > { %v602_v60 = vmax.f32 %v569_v57, 0.0  ;;  %v4492_v63 = vpack.c.bf16 %v601_v58, %v599_v61  ;;  %v3833_v57 = vld [vmem:[#allocation7 + $0x4a0] ss:$72 sps:$4 sm:$0xff]  }
 0x189   : > { %v3837_v58 = vld [vmem:[#allocation7 + $0x4a8] ss:$72 sps:$4 sm:$0xff]  }
 0x18a   : > { %v4490_v62 = vpack.c.bf16 %v602_v60, %v600_v59  ;;  %v3842_v59 = vld [vmem:[#allocation7 + $0x424] ss:$72 sps:$4 sm:$0xff]   ;;  %v3840_v61 = vld [vmem:[#allocation7 + $0x420] ss:$72 sps:$4 sm:$0xff]  }
 0x18b   : > { %v3854_v60 = vld [vmem:[#allocation7 + $0x42c] ss:$72 sps:$4 sm:$0xff]  }
 0x18c   : > { %3469 = vmatprep.mubr.msk.bf16.mxu1 %vm1741_vm1, %v4490_v62  ;;  %3478 = vmatprep.mubr.msk.bf16.mxu0 %vm1741_vm1, %v4490_v62 }
 0x18d   : > { %1924 = vmatmul.mubr.bf16.gmra.mxu1 %v4492_v63  ;;  %2037 = vmatmul.mubr.bf16.gmra.mxu0 %v4492_v63 }
 0x18e   : > { %3480 = vmatprep.mubr.msk.bf16.mxu1 %vm1741_vm1, %v4388_v28  ;;  %3489 = vmatprep.mubr.msk.bf16.mxu0 %vm1741_vm1, %v4388_v28 }
 0x195   : > { %2080 = vmatmul.mubr.bf16.vlgmr.msra.gmra.mxu1 %v4390_v31  ;;  %2193 = vmatmul.mubr.bf16.vlgmr.msra.gmra.mxu0 %v4390_v31 }
 0x196   : > { %2274 = vmatpush1.bf16.msra.mxu1 %v3782_v13  ;;  %3481 = vmatprep.mubr.msk.bf16.mxu1 %vm1741_vm1, %v4402_v50  ;;  %v3845_v13 = vld [vmem:[#allocation7 + $0x394] ss:$72 sps:$4 sm:$0xff]  }
 0x197   : > { %3490 = vmatprep.mubr.msk.bf16.mxu0 %vm1741_vm1, %v4402_v50  ;;  %2275 = vmatprep.subr.bf16.mxu1 %v3787_v14  ;;  %v3852_v14 = vld [vmem:[#allocation7 + $0x428] ss:$72 sps:$4 sm:$0xff]  }
 0x198   : > { %2387 = vmatpush1.bf16.msra.mxu0 %v3794_v0  ;;  %v3860_v0 = vld [vmem:[#allocation7 + $0x39c] ss:$72 sps:$4 sm:$0xff]  }
 0x199   : > { %2388 = vmatprep.subr.bf16.mxu0 %v3802_v3  ;;  %v3843_v3 = vld [vmem:[#allocation7 + $0x390] ss:$72 sps:$4 sm:$0xff]  }
 0x19a   : > { %2276 = vmatpush1.bf16.msra.mxu1 %v3785_v4  ;;  %v3848_v4 = vld [vmem:[#allocation7 + $0x304] ss:$72 sps:$4 sm:$0xff]  }
 0x19b   : > { %2277 = vmatprep.subr.bf16.mxu1 %v3790_v5  ;;  %v3858_v5 = vld [vmem:[#allocation7 + $0x398] ss:$72 sps:$4 sm:$0xff]  }
 0x19c   : > { %2389 = vmatpush1.bf16.msra.mxu0 %v3800_v6  ;;  %v3846_v6 = vld [vmem:[#allocation7 + $0x300] ss:$72 sps:$4 sm:$0xff]  }
 0x19d   : > { %2090 = vmatmul.mubr.bf16.gmra.mxu1 %v4404_v53  ;;  %2203 = vmatmul.mubr.bf16.gmra.mxu0 %v4404_v53 }
 0x19e   : > { %3482 = vmatprep.mubr.msk.bf16.mxu1 %vm1741_vm1, %v4416_v11  ;;  %3491 = vmatprep.mubr.msk.bf16.mxu0 %vm1741_vm1, %v4416_v11 }
 0x19f   : > { %2278 = vmatpush1.bf16.msra.mxu1 %v3788_v7  ;;  %2390 = vmatprep.subr.bf16.mxu0 %v3808_v12  ;;  %v3866_v7 = vld [vmem:[#allocation7 + $0x30c] ss:$72 sps:$4 sm:$0xff]  }
 0x1a0   : > { %2279 = vmatprep.subr.bf16.mxu1 %v3793_v15  ;;  %2391 = vmatpush1.bf16.msra.mxu0 %v3806_v17  ;;  %v3851_v12 = vld [vmem:[#allocation7 + $0x274] ss:$72 sps:$4 sm:$0xff]   ;;  %v3864_v15 = vld [vmem:[#allocation7 + $0x308] ss:$72 sps:$4 sm:$0xff]  }
 0x1a1   : > { %2392 = vmatprep.subr.bf16.mxu0 %v3811_v18  ;;  %v3869_v17 = vld [vmem:[#allocation7 + $0x27c] ss:$72 sps:$4 sm:$0xff]   ;;  %v3849_v18 = vld [vmem:[#allocation7 + $0x270] ss:$72 sps:$4 sm:$0xff]  }
 0x1a3   : > { %2280 = vmatpush1.bf16.msra.mxu1 %v3791_v19  ;;  %v3857_v19 = vld [vmem:[#allocation7 + $0x1e4] ss:$72 sps:$4 sm:$0xff]  }
 0x1a4   : > { %2281 = vmatprep.subr.bf16.mxu1 %v3799_v20  ;;  %2393 = vmatpush1.bf16.msra.mxu0 %v3809_v21  ;;  %v3867_v20 = vld [vmem:[#allocation7 + $0x278] ss:$72 sps:$4 sm:$0xff]  }
 0x1a5   : > { %2100 = vmatmul.mubr.bf16.gmra.mxu1 %v4418_v16  ;;  %2213 = vmatmul.mubr.bf16.gmra.mxu0 %v4418_v16  ;;  %v3855_v21 = vld [vmem:[#allocation7 + $0x1e0] ss:$72 sps:$4 sm:$0xff]  }
 0x1a6   : > { %3483 = vmatprep.mubr.msk.bf16.mxu1 %vm1741_vm1, %v4430_v37  ;;  %3492 = vmatprep.mubr.msk.bf16.mxu0 %vm1741_vm1, %v4430_v37 }
 0x1a7   : > { %2282 = vmatpush1.bf16.msra.mxu1 %v3797_v22  ;;  %2394 = vmatprep.subr.bf16.mxu0 %v3817_v23  ;;  %v3875_v22 = vld [vmem:[#allocation7 + $0x1ec] ss:$72 sps:$4 sm:$0xff]  }
 0x1a8   : > { %2283 = vmatprep.subr.bf16.mxu1 %v3805_v24  ;;  %2395 = vmatpush1.bf16.msra.mxu0 %v3815_v25  ;;  %v3863_v23 = vld [vmem:[#allocation7 + $0x154] ss:$72 sps:$4 sm:$0xff]   ;;  %v3873_v24 = vld [vmem:[#allocation7 + $0x1e8] ss:$72 sps:$4 sm:$0xff]  }
 0x1a9   : > { %2396 = vmatprep.subr.bf16.mxu0 %v3823_v26  ;;  %v3881_v25 = vld [vmem:[#allocation7 + $0x15c] ss:$72 sps:$4 sm:$0xff]   ;;  %v3861_v26 = vld [vmem:[#allocation7 + $0x150] ss:$72 sps:$4 sm:$0xff]  }
 0x1ab   : > { %2284 = vmatpush1.bf16.msra.mxu1 %v3803_v27  ;;  %v3872_v27 = vld [vmem:[#allocation7 + $0xc4] ss:$72 sps:$4 sm:$0xff]  }
 0x1ac   : > { %2285 = vmatprep.subr.bf16.mxu1 %v3814_v29  ;;  %2397 = vmatpush1.bf16.msra.mxu0 %v3821_v30  ;;  %v3879_v29 = vld [vmem:[#allocation7 + $0x158] ss:$72 sps:$4 sm:$0xff]  }
 0x1ad   : > { %2110 = vmatmul.mubr.bf16.gmra.mxu1 %v4432_v40  ;;  %2223 = vmatmul.mubr.bf16.gmra.mxu0 %v4432_v40  ;;  %v3870_v30 = vld [vmem:[#allocation7 + $0xc0] ss:$72 sps:$4 sm:$0xff]  }
 0x1ae   : > { %3484 = vmatprep.mubr.msk.bf16.mxu1 %vm1741_vm1, %v4444_v1  ;;  %3493 = vmatprep.mubr.msk.bf16.mxu0 %vm1741_vm1, %v4444_v1 }
 0x1af   : > { %2286 = vmatpush1.bf16.msra.mxu1 %v3812_v34  ;;  %2398 = vmatprep.subr.bf16.mxu0 %v3826_v35  ;;  %v3884_v34 = vld [vmem:[#allocation7 + $0xcc] ss:$72 sps:$4 sm:$0xff]  }
 0x1b0   : > { %2287 = vmatprep.subr.bf16.mxu1 %v3820_v36  ;;  %2399 = vmatpush1.bf16.msra.mxu0 %v3824_v38  ;;  %v3878_v35 = vld [vmem:[#allocation7 + $0x34] ss:$72 sps:$4 sm:$0xff]   ;;  %v3882_v36 = vld [vmem:[#allocation7 + $0xc8] ss:$72 sps:$4 sm:$0xff]   ;;  %v787_v38 = vld [vmem:[#allocation7 + $0x540] sm:$0x77] }
 0x1b1   : > { %2400 = vmatprep.subr.bf16.mxu0 %v3831_v41  ;;  %v788_v41 = vld [vmem:[#allocation7 + $0x548] sm:$0x77] }
 0x1b2   : > { %v3458_v47 = vcombine.high %v788_v41, %v788_v41 }
 0x1b3   : > { %2288 = vmatpush1.bf16.msra.mxu1 %v3818_v43  ;;  %v3456_v43 = vcombine.high %v787_v38, %v787_v38 }
 0x1b4   : > { %3497 = vmatprep.subr.msk.bf16.mxu1 %vm1766_vm0, %v3452_v44  ;;  %2401 = vmatpush1.bf16.msra.mxu0 %v3829_v46  ;;  %v3455_v44 = vcombine.low %v787_v38, %v787_v38  ;;  %v3457_v46 = vcombine.low %v788_v41, %v788_v41 }
 0x1b5   : > { %2120 = vmatmul.mubr.bf16.gmra.mxu1 %v4446_v2  ;;  %2233 = vmatmul.mubr.bf16.gmra.mxu0 %v4446_v2 }
 0x1b6   : > { %3485 = vmatprep.mubr.msk.bf16.mxu1 %vm1741_vm1, %v4462_v32  ;;  %3494 = vmatprep.mubr.msk.bf16.mxu0 %vm1741_vm1, %v4462_v32 }
 0x1b7   : > { %2302 = vmatpush2.bf16.msra.mxu1 %v1792_v52  ;;  %3506 = vmatprep.subr.msk.bf16.mxu0 %vm1766_vm0, %v3454_v51  ;;  %v1804_v51 = vsel %vm1766_vm0, %v3455_v44, 0  ;;  %v3893_v52 = vld [vmem:[#allocation7 + $0x4b4] ss:$72 sps:$4 sm:$0xff]  }
 0x1b8   : > { %2303 = vmatprep.subr.bf16.mxu1 %v3835_v54  ;;  %2415 = vmatpush2.bf16.msra.mxu0 %v1798_v55  ;;  %v1810_v54 = vsel %vm1766_vm0, %v3457_v46, 0  ;;  %v3897_v55 = vld [vmem:[#allocation7 + $0x4bc] ss:$72 sps:$4 sm:$0xff]  }
 0x1b9   : > { %2416 = vmatprep.subr.bf16.mxu0 %v3839_v56  ;;  %v3891_v56 = vld [vmem:[#allocation7 + $0x4b0] ss:$72 sps:$4 sm:$0xff]  }
 0x1bb   : > { %2304 = vmatpush2.bf16.msra.mxu1 %v3833_v57  ;;  %v3895_v57 = vld [vmem:[#allocation7 + $0x4b8] ss:$72 sps:$4 sm:$0xff]  }
 0x1bc   : > { %2417 = vmatpush2.bf16.msra.mxu0 %v3837_v58  ;;  %2499 = vmatprep.subr.bf16.mxu1 %v3842_v59  ;;  %v3900_v58 = vld [vmem:[#allocation7 + $0x434] ss:$72 sps:$4 sm:$0xff]   ;;  %v806_v59 = vsub.s32 2, %v4370_v8 }
 0x1bd   : > { %2130 = vmatmul.mubr.bf16.gmra.mxu1 %v4464_v33  ;;  %2243 = vmatmul.mubr.bf16.gmra.mxu0 %v4464_v33 }
 0x1be   : > { %3486 = vmatprep.mubr.msk.bf16.mxu1 %vm1741_vm1, %v4476_v48  ;;  %3495 = vmatprep.mubr.msk.bf16.mxu0 %vm1741_vm1, %v4476_v48 }
 0x1bf   : > { %2612 = vmatprep.subr.bf16.mxu0 %v3854_v60  ;;  %v4609_v60 = vld [vmem:[#allocation8] sm:$0xff] }
 0x1c5   : > { %2140 = vmatmul.mubr.bf16.gmra.mxu1 %v4478_v49  ;;  %2253 = vmatmul.mubr.bf16.gmra.mxu0 %v4478_v49 }
 0x1c6   : > { %3487 = vmatprep.mubr.msk.bf16.mxu1 %vm1741_vm1, %v4490_v62  ;;  %3496 = vmatprep.mubr.msk.bf16.mxu0 %vm1741_vm1, %v4490_v62 }
 0x1cd   : > { %2150 = vmatmul.mubr.bf16.gmra.mxu1 %v4492_v63  ;;  %2263 = vmatmul.mubr.bf16.gmra.mxu0 %v4492_v63 }
 0x1ce   : > { %3498 = vmatprep.mubr.msk.bf16.mxu1 %vm1741_vm1, %v4388_v28  ;;  %3507 = vmatprep.mubr.msk.bf16.mxu0 %vm1741_vm1, %v4388_v28 }
 0x1d5   : > { %2306 = vmatmul.mubr.bf16.vlgmr.msra.gmra.mxu1 %v4390_v31  ;;  %2419 = vmatmul.mubr.bf16.vlgmr.msra.gmra.mxu0 %v4390_v31 }
 0x1d6   : > { %2500 = vmatpush1.bf16.msra.mxu1 %v3840_v61  ;;  %3499 = vmatprep.mubr.msk.bf16.mxu1 %vm1741_vm1, %v4402_v50  ;;  %v810_v61 = vsub.s32 3, %v4370_v8 }
 0x1d7   : > { %3508 = vmatprep.mubr.msk.bf16.mxu0 %vm1741_vm1, %v4402_v50  ;;  %2501 = vmatprep.subr.bf16.mxu1 %v3845_v13  ;;  %v3898_v13 = vld [vmem:[#allocation7 + $0x430] ss:$72 sps:$4 sm:$0xff]  }
 0x1d8   : > { %2613 = vmatpush1.bf16.msra.mxu0 %v3852_v14  ;;  %v4615_v14 = vrot.slane %v4609_v60, %v4376_v10 }
 0x1d9   : > { %2614 = vmatprep.subr.bf16.mxu0 %v3860_v0  ;;  %v4620_v0 = vrot.slane %v4609_v60, %v806_v59 }
 0x1da   : > { %2502 = vmatpush1.bf16.msra.mxu1 %v3843_v3  ;;  %v3903_v3 = vld [vmem:[#allocation7 + $0x3a4] ss:$72 sps:$4 sm:$0xff]  }
 0x1db   : > { %2503 = vmatprep.subr.bf16.mxu1 %v3848_v4  ;;  %v4624_v4 = vrot.slane %v4609_v60, %v4373_v9 }
 0x1dc   : > { %2615 = vmatpush1.bf16.msra.mxu0 %v3858_v5  ;;  %v4629_v5 = vrot.slane %v4609_v60, %v810_v61 }
 0x1dd   : > { %2316 = vmatmul.mubr.bf16.gmra.mxu1 %v4404_v53  ;;  %2429 = vmatmul.mubr.bf16.gmra.mxu0 %v4404_v53 }
 0x1de   : > { %3500 = vmatprep.mubr.msk.bf16.mxu1 %vm1741_vm1, %v4416_v11  ;;  %3509 = vmatprep.mubr.msk.bf16.mxu0 %vm1741_vm1, %v4416_v11 }
 0x1df   : > { %2504 = vmatpush1.bf16.msra.mxu1 %v3846_v6  ;;  %2616 = vmatprep.subr.bf16.mxu0 %v3866_v7 }
 0x1e0   : > { %2505 = vmatprep.subr.bf16.mxu1 %v3851_v12  ;;  %2617 = vmatpush1.bf16.msra.mxu0 %v3864_v15 }
 0x1e1   : > { %2618 = vmatprep.subr.bf16.mxu0 %v3869_v17  ;;  %v3901_v17 = vld [vmem:[#allocation7 + $0x3a0] ss:$72 sps:$4 sm:$0xff]  }
 0x1e3   : > { %2506 = vmatpush1.bf16.msra.mxu1 %v3849_v18 }
 0x1e4   : > { %2507 = vmatprep.subr.bf16.mxu1 %v3857_v19  ;;  %2619 = vmatpush1.bf16.msra.mxu0 %v3867_v20  ;;  %v3906_v20 = vld [vmem:[#allocation7 + $0x314] ss:$72 sps:$4 sm:$0xff]  }
 0x1e5   : > { %2326 = vmatmul.mubr.bf16.gmra.mxu1 %v4418_v16  ;;  %2439 = vmatmul.mubr.bf16.gmra.mxu0 %v4418_v16 }
 0x1e6   : > { %3501 = vmatprep.mubr.msk.bf16.mxu1 %vm1741_vm1, %v4430_v37  ;;  %3510 = vmatprep.mubr.msk.bf16.mxu0 %vm1741_vm1, %v4430_v37 }
 0x1e7   : > { %2508 = vmatpush1.bf16.msra.mxu1 %v3855_v21  ;;  %2620 = vmatprep.subr.bf16.mxu0 %v3875_v22 }
 0x1e8   : > { %2509 = vmatprep.subr.bf16.mxu1 %v3863_v23  ;;  %2621 = vmatpush1.bf16.msra.mxu0 %v3873_v24 }
 0x1e9   : > { %2622 = vmatprep.subr.bf16.mxu0 %v3881_v25 }
 0x1eb   : > { %2510 = vmatpush1.bf16.msra.mxu1 %v3861_v26 }
 0x1ec   : > { %2511 = vmatprep.subr.bf16.mxu1 %v3872_v27  ;;  %2623 = vmatpush1.bf16.msra.mxu0 %v3879_v29 }
 0x1ed   : > { %2336 = vmatmul.mubr.bf16.gmra.mxu1 %v4432_v40  ;;  %2449 = vmatmul.mubr.bf16.gmra.mxu0 %v4432_v40 }
 0x1ee   : > { %3502 = vmatprep.mubr.msk.bf16.mxu1 %vm1741_vm1, %v4444_v1  ;;  %3511 = vmatprep.mubr.msk.bf16.mxu0 %vm1741_vm1, %v4444_v1 }
 0x1ef   : > { %2512 = vmatpush1.bf16.msra.mxu1 %v3870_v30  ;;  %2624 = vmatprep.subr.bf16.mxu0 %v3884_v34  ;;  %v3904_v30 = vld [vmem:[#allocation7 + $0x310] ss:$72 sps:$4 sm:$0xff]  }
 0x1f0   : > { %2513 = vmatprep.subr.bf16.mxu1 %v3878_v35  ;;  %2625 = vmatpush1.bf16.msra.mxu0 %v3882_v36  ;;  %v3909_v36 = vld [vmem:[#allocation7 + $0x284] ss:$72 sps:$4 sm:$0xff]  }
 0x1f1   : > { %2626 = vmatprep.subr.bf16.mxu0 %v3889_v39 }
 0x1f3   : > { %2514 = vmatpush1.bf16.msra.mxu1 %v3876_v42 }
 0x1f4   : > { %3515 = vmatprep.subr.msk.bf16.mxu1 %vm1766_vm0, %v3456_v43  ;;  %2627 = vmatpush1.bf16.msra.mxu0 %v3887_v45  ;;  %v3907_v45 = vld [vmem:[#allocation7 + $0x280] ss:$72 sps:$4 sm:$0xff]  }
 0x1f5   : > { %2346 = vmatmul.mubr.bf16.gmra.mxu1 %v4446_v2  ;;  %2459 = vmatmul.mubr.bf16.gmra.mxu0 %v4446_v2 }
 0x1f6   : > { %3503 = vmatprep.mubr.msk.bf16.mxu1 %vm1741_vm1, %v4462_v32  ;;  %3512 = vmatprep.mubr.msk.bf16.mxu0 %vm1741_vm1, %v4462_v32 }
 0x1f7   : > { %2528 = vmatpush2.bf16.msra.mxu1 %v1804_v51  ;;  %3524 = vmatprep.subr.msk.bf16.mxu0 %vm1766_vm0, %v3458_v47  ;;  %v3912_v51 = vld [vmem:[#allocation7 + $0x1f4] ss:$72 sps:$4 sm:$0xff]  }
 0x1f8   : > { %2529 = vmatprep.subr.bf16.mxu1 %v3893_v52  ;;  %2641 = vmatpush2.bf16.msra.mxu0 %v1810_v54 }
 0x1f9   : > { %2642 = vmatprep.subr.bf16.mxu0 %v3897_v55 }
 0x1fb   : > { %2530 = vmatpush2.bf16.msra.mxu1 %v3891_v56 }
 0x1fc   : > { %2643 = vmatpush2.bf16.msra.mxu0 %v3895_v57  ;;  %2725 = vmatprep.subr.bf16.mxu1 %v3900_v58 }
 0x1fd   : > { %2356 = vmatmul.mubr.bf16.gmra.mxu1 %v4464_v33  ;;  %2469 = vmatmul.mubr.bf16.gmra.mxu0 %v4464_v33 }
 0x1fe   : > { %3504 = vmatprep.mubr.msk.bf16.mxu1 %vm1741_vm1, %v4476_v48  ;;  %3513 = vmatprep.mubr.msk.bf16.mxu0 %vm1741_vm1, %v4476_v48 }
 0x205   : > { %2366 = vmatmul.mubr.bf16.gmra.mxu1 %v4478_v49  ;;  %2479 = vmatmul.mubr.bf16.gmra.mxu0 %v4478_v49 }
 0x206   : > { %3505 = vmatprep.mubr.msk.bf16.mxu1 %vm1741_vm1, %v4490_v62  ;;  %3514 = vmatprep.mubr.msk.bf16.mxu0 %vm1741_vm1, %v4490_v62 }
 0x20d   : > { %2376 = vmatmul.mubr.bf16.gmra.mxu1 %v4492_v63  ;;  %2489 = vmatmul.mubr.bf16.gmra.mxu0 %v4492_v63 }
 0x20e   : > { %3516 = vmatprep.mubr.msk.bf16.mxu1 %vm1741_vm1, %v4388_v28  ;;  %3525 = vmatprep.mubr.msk.bf16.mxu0 %vm1741_vm1, %v4388_v28 }
 0x215   : > { %v1855_v6 = vpop.f32.mrf.mxu1  ;;  %v1968_v7 = vpop.f32.mrf.mxu0  ;;  %2532 = vmatmul.mubr.bf16.vlgmr.msra.gmra.mxu1 %v4390_v31  ;;  %2645 = vmatmul.mubr.bf16.vlgmr.msra.gmra.mxu0 %v4390_v31 }
 0x216   : > { %v1856_v12 = vadd.f32 %v1855_v6, %v4615_v14  ;;  %v1969_v15 = vadd.f32 %v1968_v7, %v4620_v0  ;;  %2726 = vmatpush1.bf16.msra.mxu1 %v3898_v13  ;;  %3517 = vmatprep.mubr.msk.bf16.mxu1 %vm1741_vm1, %v4402_v50  ;;  %v3910_v13 = vld [vmem:[#allocation7 + $0x1f0] ss:$72 sps:$4 sm:$0xff]   ;;  %v3915_v7 = vld [vmem:[#allocation7 + $0x164] ss:$72 sps:$4 sm:$0xff]  }
 0x217   : > { %3526 = vmatprep.mubr.msk.bf16.mxu0 %vm1741_vm1, %v4402_v50  ;;  %v1857_v18 = vpop.f32.mrf.mxu1  ;;  %v1970_v19 = vpop.f32.mrf.mxu0  ;;  %2727 = vmatprep.subr.bf16.mxu1 %v3903_v3 }
 0x218   : > { %2838 = vst [vmem:[%s4639_s16] sm:$0xff] %v1856_v12  ;;  %2840 = vst [vmem:[%s4639_s16 + $0x10] sm:$0xff] %v1969_v15  ;;  %v1858_v21 = vadd.f32 %v1857_v18, %v4624_v4  ;;  %v1971_v22 = vadd.f32 %v1970_v19, %v4629_v5 }
 0x219   : > { %v1859_v23 = vpop.f32.mrf.mxu1  ;;  %v1972_v24 = vpop.f32.mrf.mxu0 }
 0x21a   : > { %2839 = vst [vmem:[%s4639_s16 + $0x8] sm:$0xff] %v1858_v21  ;;  %2841 = vst [vmem:[%s4639_s16 + $0x18] sm:$0xff] %v1971_v22  ;;  %v1860_v25 = vadd.f32 %v1859_v23, %v4615_v14  ;;  %v1973_v26 = vadd.f32 %v1972_v24, %v4620_v0  ;;  %2728 = vmatpush1.bf16.msra.mxu1 %v3901_v17  ;;  %v3913_v21 = vld [vmem:[#allocation7 + $0x160] ss:$72 sps:$4 sm:$0xff]   ;;  %v3918_v24 = vld [vmem:[#allocation7 + $0xd4] ss:$72 sps:$4 sm:$0xff]  }
 0x21b   : > { %v1861_v27 = vpop.f32.mrf.mxu1  ;;  %v1974_v29 = vpop.f32.mrf.mxu0  ;;  %2729 = vmatprep.subr.bf16.mxu1 %v3906_v20 }
 0x21c   : > { %2856 = vst [vmem:[%s4639_s16 + $0x90] sm:$0xff] %v1860_v25  ;;  %2858 = vst [vmem:[%s4639_s16 + $0xa0] sm:$0xff] %v1973_v26  ;;  %v1862_v34 = vadd.f32 %v1861_v27, %v4624_v4  ;;  %v1975_v35 = vadd.f32 %v1974_v29, %v4629_v5 }
 0x21d   : > { %v1865_v38 = vpop.f32.mrf.mxu1  ;;  %v1978_v39 = vpop.f32.mrf.mxu0  ;;  %2542 = vmatmul.mubr.bf16.gmra.mxu1 %v4404_v53  ;;  %2655 = vmatmul.mubr.bf16.gmra.mxu0 %v4404_v53 }
 0x21e   : > { %2857 = vst [vmem:[%s4639_s16 + $0x98] sm:$0xff] %v1862_v34  ;;  %2859 = vst [vmem:[%s4639_s16 + $0xa8] sm:$0xff] %v1975_v35  ;;  %v1866_v41 = vadd.f32 %v1865_v38, %v4615_v14  ;;  %v1979_v42 = vadd.f32 %v1978_v39, %v4620_v0  ;;  %3518 = vmatprep.mubr.msk.bf16.mxu1 %vm1741_vm1, %v4416_v11  ;;  %3527 = vmatprep.mubr.msk.bf16.mxu0 %vm1741_vm1, %v4416_v11  ;;  %v3916_v35 = vld [vmem:[#allocation7 + $0xd0] ss:$72 sps:$4 sm:$0xff]   ;;  %v3921_v39 = vld [vmem:[#allocation7 + $0x44] ss:$72 sps:$4 sm:$0xff]  }
 0x21f   : > { %v1867_v43 = vpop.f32.mrf.mxu1  ;;  %v1980_v44 = vpop.f32.mrf.mxu0  ;;  %2730 = vmatpush1.bf16.msra.mxu1 %v3904_v30 }
 0x220   : > { %2874 = vst [vmem:[%s4639_s16 + $0x120] sm:$0xff] %v1866_v41  ;;  %2876 = vst [vmem:[%s4639_s16 + $0x130] sm:$0xff] %v1979_v42  ;;  %v1868_v46 = vadd.f32 %v1867_v43, %v4624_v4  ;;  %v1981_v47 = vadd.f32 %v1980_v44, %v4629_v5  ;;  %2731 = vmatprep.subr.bf16.mxu1 %v3909_v36  ;;  %v789_v43 = vld [vmem:[#allocation7 + $0x550] sm:$0x77] }
 0x221   : > { %v1869_v52 = vpop.f32.mrf.mxu1  ;;  %v1982_v54 = vpop.f32.mrf.mxu0 }
 0x222   : > { %2875 = vst [vmem:[%s4639_s16 + $0x128] sm:$0xff] %v1868_v46  ;;  %2877 = vst [vmem:[%s4639_s16 + $0x138] sm:$0xff] %v1981_v47  ;;  %v1870_v55 = vadd.f32 %v1869_v52, %v4615_v14  ;;  %v1983_v56 = vadd.f32 %v1982_v54, %v4620_v0 }
 0x223   : > { %v1871_v57 = vpop.f32.mrf.mxu1  ;;  %v1984_v58 = vpop.f32.mrf.mxu0  ;;  %2732 = vmatpush1.bf16.msra.mxu1 %v3907_v45 }
 0x224   : > { %2892 = vst [vmem:[%s4639_s16 + $0x1b0] sm:$0xff] %v1870_v55  ;;  %2894 = vst [vmem:[%s4639_s16 + $0x1c0] sm:$0xff] %v1983_v56  ;;  %v1872_v3 = vadd.f32 %v1871_v57, %v4624_v4  ;;  %v1985_v6 = vadd.f32 %v1984_v58, %v4629_v5  ;;  %2733 = vmatprep.subr.bf16.mxu1 %v3912_v51  ;;  %v3919_v51 = vld [vmem:[#allocation7 + $0x40] ss:$72 sps:$4 sm:$0xff]   ;;  %v3460_v55 = vcombine.high %v789_v43, %v789_v43 }
 0x225   : > { %v1875_v12 = vpop.f32.mrf.mxu1  ;;  %v1988_v15 = vpop.f32.mrf.mxu0  ;;  %2552 = vmatmul.mubr.bf16.gmra.mxu1 %v4418_v16  ;;  %2665 = vmatmul.mubr.bf16.gmra.mxu0 %v4418_v16  ;;  %v3459_v56 = vcombine.low %v789_v43, %v789_v43 }
 0x226   : > { %2893 = vst [vmem:[%s4639_s16 + $0x1b8] sm:$0xff] %v1872_v3  ;;  %2895 = vst [vmem:[%s4639_s16 + $0x1c8] sm:$0xff] %v1985_v6  ;;  %v1876_v17 = vadd.f32 %v1875_v12, %v4615_v14  ;;  %v1989_v18 = vadd.f32 %v1988_v15, %v4620_v0  ;;  %3519 = vmatprep.mubr.msk.bf16.mxu1 %vm1741_vm1, %v4430_v37  ;;  %3528 = vmatprep.mubr.msk.bf16.mxu0 %vm1741_vm1, %v4430_v37 }
 0x227   : > { %v1877_v19 = vpop.f32.mrf.mxu1  ;;  %v1990_v20 = vpop.f32.mrf.mxu0  ;;  %2734 = vmatpush1.bf16.msra.mxu1 %v3910_v13 }
 0x228   : > { %2910 = vst [vmem:[%s4639_s16 + $0x240] sm:$0xff] %v1876_v17  ;;  %2912 = vst [vmem:[%s4639_s16 + $0x250] sm:$0xff] %v1989_v18  ;;  %v1878_v22 = vadd.f32 %v1877_v19, %v4624_v4  ;;  %v1991_v23 = vadd.f32 %v1990_v20, %v4629_v5  ;;  %2735 = vmatprep.subr.bf16.mxu1 %v3915_v7  ;;  %v1816_v17 = vsel %vm1766_vm0, %v3459_v56, 0  ;;  %v3926_v18 = vld [vmem:[#allocation7 + $0x4c4] ss:$72 sps:$4 sm:$0xff]  }
 0x229   : > { %v1879_v25 = vpop.f32.mrf.mxu1  ;;  %v1992_v26 = vpop.f32.mrf.mxu0 }
 0x22a   : > { %2911 = vst [vmem:[%s4639_s16 + $0x248] sm:$0xff] %v1878_v22  ;;  %2913 = vst [vmem:[%s4639_s16 + $0x258] sm:$0xff] %v1991_v23  ;;  %v1880_v27 = vadd.f32 %v1879_v25, %v4615_v14  ;;  %v1993_v29 = vadd.f32 %v1992_v26, %v4620_v0  ;;  %v3924_v25 = vld [vmem:[#allocation7 + $0x4c0] ss:$72 sps:$4 sm:$0xff]  }
 0x22b   : > { %v1881_v30 = vpop.f32.mrf.mxu1  ;;  %v1994_v34 = vpop.f32.mrf.mxu0  ;;  %2736 = vmatpush1.bf16.msra.mxu1 %v3913_v21 }
 0x22c   : > { %2928 = vst [vmem:[%s4639_s16 + $0x2d0] sm:$0xff] %v1880_v27  ;;  %2930 = vst [vmem:[%s4639_s16 + $0x2e0] sm:$0xff] %v1993_v29  ;;  %v1882_v36 = vadd.f32 %v1881_v30, %v4624_v4  ;;  %v1995_v38 = vadd.f32 %v1994_v34, %v4629_v5  ;;  %2737 = vmatprep.subr.bf16.mxu1 %v3918_v24 }
 0x22d   : > { %v1885_v41 = vpop.f32.mrf.mxu1  ;;  %v1998_v42 = vpop.f32.mrf.mxu0  ;;  %2562 = vmatmul.mubr.bf16.gmra.mxu1 %v4432_v40  ;;  %2675 = vmatmul.mubr.bf16.gmra.mxu0 %v4432_v40 }
 0x22e   : > { %2929 = vst [vmem:[%s4639_s16 + $0x2d8] sm:$0xff] %v1882_v36  ;;  %2931 = vst [vmem:[%s4639_s16 + $0x2e8] sm:$0xff] %v1995_v38  ;;  %v1886_v44 = vadd.f32 %v1885_v41, %v4615_v14  ;;  %v1999_v45 = vadd.f32 %v1998_v42, %v4620_v0  ;;  %3520 = vmatprep.mubr.msk.bf16.mxu1 %vm1741_vm1, %v4444_v1  ;;  %3529 = vmatprep.mubr.msk.bf16.mxu0 %vm1741_vm1, %v4444_v1 }
 0x22f   : > { %v1887_v46 = vpop.f32.mrf.mxu1  ;;  %v2000_v47 = vpop.f32.mrf.mxu0  ;;  %2738 = vmatpush1.bf16.msra.mxu1 %v3916_v35 }
 0x230   : > { %2946 = vst [vmem:[%s4639_s16 + $0x360] sm:$0xff] %v1886_v44  ;;  %2948 = vst [vmem:[%s4639_s16 + $0x370] sm:$0xff] %v1999_v45  ;;  %v1888_v52 = vadd.f32 %v1887_v46, %v4624_v4  ;;  %v2001_v54 = vadd.f32 %v2000_v47, %v4629_v5  ;;  %2739 = vmatprep.subr.bf16.mxu1 %v3921_v39 }
 0x231   : > { %v1889_v57 = vpop.f32.mrf.mxu1  ;;  %v2002_v58 = vpop.f32.mrf.mxu0 }
 0x232   : > { %2947 = vst [vmem:[%s4639_s16 + $0x368] sm:$0xff] %v1888_v52  ;;  %2949 = vst [vmem:[%s4639_s16 + $0x378] sm:$0xff] %v2001_v54  ;;  %v1890_v13 = vadd.f32 %v1889_v57, %v4615_v14  ;;  %v2003_v3 = vadd.f32 %v2002_v58, %v4620_v0 }
 0x233   : > { %v1891_v6 = vpop.f32.mrf.mxu1  ;;  %v2004_v7 = vpop.f32.mrf.mxu0  ;;  %2740 = vmatpush1.bf16.msra.mxu1 %v3919_v51 }
 0x234   : > { %2964 = vst [vmem:[%s4639_s16 + $0x3f0] sm:$0xff] %v1890_v13  ;;  %2966 = vst [vmem:[%s4639_s16 + $0x400] sm:$0xff] %v2003_v3  ;;  %v1892_v12 = vadd.f32 %v1891_v6, %v4624_v4  ;;  %v2005_v15 = vadd.f32 %v2004_v7, %v4629_v5  ;;  %3533 = vmatprep.subr.msk.bf16.mxu1 %vm1766_vm0, %v3460_v55 }
 0x235   : > { %v1895_v19 = vpop.f32.mrf.mxu1  ;;  %v2008_v20 = vpop.f32.mrf.mxu0  ;;  %2572 = vmatmul.mubr.bf16.gmra.mxu1 %v4446_v2  ;;  %2685 = vmatmul.mubr.bf16.gmra.mxu0 %v4446_v2 }
 0x236   : > { %2965 = vst [vmem:[%s4639_s16 + $0x3f8] sm:$0xff] %v1892_v12  ;;  %2967 = vst [vmem:[%s4639_s16 + $0x408] sm:$0xff] %v2005_v15  ;;  %v1896_v21 = vadd.f32 %v1895_v19, %v4615_v14  ;;  %v2009_v22 = vadd.f32 %v2008_v20, %v4620_v0  ;;  %3521 = vmatprep.mubr.msk.bf16.mxu1 %vm1741_vm1, %v4462_v32  ;;  %3530 = vmatprep.mubr.msk.bf16.mxu0 %vm1741_vm1, %v4462_v32 }
 0x237   : > { %v1897_v23 = vpop.f32.mrf.mxu1  ;;  %v2010_v24 = vpop.f32.mrf.mxu0  ;;  %2754 = vmatpush2.bf16.msra.mxu1 %v1816_v17 }
 0x238   : > { %2982 = vst [vmem:[%s4639_s16 + $0x480] sm:$0xff] %v1896_v21  ;;  %2984 = vst [vmem:[%s4639_s16 + $0x490] sm:$0xff] %v2009_v22  ;;  %v1898_v26 = vadd.f32 %v1897_v23, %v4624_v4  ;;  %v2011_v27 = vadd.f32 %v2010_v24, %v4629_v5  ;;  %2755 = vmatprep.subr.bf16.mxu1 %v3926_v18 }
 0x239   : > { %v1899_v29 = vpop.f32.mrf.mxu1  ;;  %v2012_v30 = vpop.f32.mrf.mxu0 }
 0x23a   : > { %2983 = vst [vmem:[%s4639_s16 + $0x488] sm:$0xff] %v1898_v26  ;;  %2985 = vst [vmem:[%s4639_s16 + $0x498] sm:$0xff] %v2011_v27  ;;  %v1900_v34 = vadd.f32 %v1899_v29, %v4615_v14  ;;  %v2013_v35 = vadd.f32 %v2012_v30, %v4620_v0 }
 0x23b   : > { %v1901_v36 = vpop.f32.mrf.mxu1  ;;  %v2014_v38 = vpop.f32.mrf.mxu0  ;;  %2756 = vmatpush2.bf16.msra.mxu1 %v3924_v25 }
 0x23c   : > { %3000 = vst [vmem:[%s4639_s16 + $0x510] sm:$0xff] %v1900_v34  ;;  %3002 = vst [vmem:[%s4639_s16 + $0x520] sm:$0xff] %v2013_v35  ;;  %v1902_v39 = vadd.f32 %v1901_v36, %v4624_v4  ;;  %v2015_v41 = vadd.f32 %v2014_v38, %v4629_v5 }
 0x23d   : > { %v1905_v42 = vpop.f32.mrf.mxu1  ;;  %v2018_v43 = vpop.f32.mrf.mxu0  ;;  %2582 = vmatmul.mubr.bf16.gmra.mxu1 %v4464_v33  ;;  %2695 = vmatmul.mubr.bf16.gmra.mxu0 %v4464_v33 }
 0x23e   : > { %3001 = vst [vmem:[%s4639_s16 + $0x518] sm:$0xff] %v1902_v39  ;;  %3003 = vst [vmem:[%s4639_s16 + $0x528] sm:$0xff] %v2015_v41  ;;  %v1906_v44 = vadd.f32 %v1905_v42, %v4615_v14  ;;  %v2019_v45 = vadd.f32 %v2018_v43, %v4620_v0  ;;  %3522 = vmatprep.mubr.msk.bf16.mxu1 %vm1741_vm1, %v4476_v48  ;;  %3531 = vmatprep.mubr.msk.bf16.mxu0 %vm1741_vm1, %v4476_v48  ;;  %v814_v39 = vsub.s32 4, %v4370_v8 }
 0x23f   : > { %v1907_v46 = vpop.f32.mrf.mxu1  ;;  %v2020_v47 = vpop.f32.mrf.mxu0  ;;  %v822_v41 = vsub.s32 6, %v4370_v8 }
 0x240   : > { %3018 = vst [vmem:[%s4639_s16 + $0x5a0] sm:$0xff] %v1906_v44  ;;  %3020 = vst [vmem:[%s4639_s16 + $0x5b0] sm:$0xff] %v2019_v45  ;;  %v1908_v51 = vadd.f32 %v1907_v46, %v4624_v4  ;;  %v2021_v52 = vadd.f32 %v2020_v47, %v4629_v5  ;;  %v818_v46 = vsub.s32 5, %v4370_v8  ;;  %v826_v47 = vsub.s32 7, %v4370_v8 }
 0x241   : > { %v1909_v54 = vpop.f32.mrf.mxu1  ;;  %v2022_v55 = vpop.f32.mrf.mxu0 }
 0x242   : > { %3019 = vst [vmem:[%s4639_s16 + $0x5a8] sm:$0xff] %v1908_v51  ;;  %3021 = vst [vmem:[%s4639_s16 + $0x5b8] sm:$0xff] %v2021_v52  ;;  %v1910_v56 = vadd.f32 %v1909_v54, %v4615_v14  ;;  %v2023_v57 = vadd.f32 %v2022_v55, %v4620_v0  ;;  %v4810_v55 = vrot.slane %v4609_v60, %v814_v39 }
 0x243   : > { %v1911_v58 = vpop.f32.mrf.mxu1  ;;  %v2024_v13 = vpop.f32.mrf.mxu0 }
 0x244   : > { %3036 = vst [vmem:[%s4639_s16 + $0x630] sm:$0xff] %v1910_v56  ;;  %3038 = vst [vmem:[%s4639_s16 + $0x640] sm:$0xff] %v2023_v57  ;;  %v1912_v3 = vadd.f32 %v1911_v58, %v4624_v4  ;;  %v2025_v6 = vadd.f32 %v2024_v13, %v4629_v5  ;;  %v4815_v56 = vrot.slane %v4609_v60, %v822_v41 }
 0x245   : > { %v1915_v7 = vpop.f32.mrf.mxu1  ;;  %v2028_v12 = vpop.f32.mrf.mxu0  ;;  %2592 = vmatmul.mubr.bf16.gmra.mxu1 %v4478_v49  ;;  %2705 = vmatmul.mubr.bf16.gmra.mxu0 %v4478_v49  ;;  %v4824_v13 = vrot.slane %v4609_v60, %v818_v46 }
 0x246   : > { %3037 = vst [vmem:[%s4639_s16 + $0x638] sm:$0xff] %v1912_v3  ;;  %3039 = vst [vmem:[%s4639_s16 + $0x648] sm:$0xff] %v2025_v6  ;;  %v1916_v15 = vadd.f32 %v1915_v7, %v4615_v14  ;;  %v2029_v17 = vadd.f32 %v2028_v12, %v4620_v0  ;;  %3523 = vmatprep.mubr.msk.bf16.mxu1 %vm1741_vm1, %v4490_v62  ;;  %3532 = vmatprep.mubr.msk.bf16.mxu0 %vm1741_vm1, %v4490_v62 }
 0x247   : > { %v1917_v18 = vpop.f32.mrf.mxu1  ;;  %v2030_v19 = vpop.f32.mrf.mxu0  ;;  %v4829_v3 = vrot.slane %v4609_v60, %v826_v47 }
 0x248   : > { %3054 = vst [vmem:[%s4639_s16 + $0x6c0] sm:$0xff] %v1916_v15  ;;  %3056 = vst [vmem:[%s4639_s16 + $0x6d0] sm:$0xff] %v2029_v17  ;;  %v1918_v20 = vadd.f32 %v1917_v18, %v4624_v4  ;;  %v2031_v21 = vadd.f32 %v2030_v19, %v4629_v5 }
 0x249   : > { %v1919_v22 = vpop.f32.mrf.mxu1  ;;  %v2032_v23 = vpop.f32.mrf.mxu0 }
 0x24a   : > { %3055 = vst [vmem:[%s4639_s16 + $0x6c8] sm:$0xff] %v1918_v20  ;;  %3057 = vst [vmem:[%s4639_s16 + $0x6d8] sm:$0xff] %v2031_v21  ;;  %v1920_v24 = vadd.f32 %v1919_v22, %v4615_v14  ;;  %v2033_v25 = vadd.f32 %v2032_v23, %v4620_v0 }
 0x24b   : > { %v1921_v26 = vpop.f32.mrf.mxu1  ;;  %v2034_v27 = vpop.f32.mrf.mxu0 }
 0x24c   : > { %3072 = vst [vmem:[%s4639_s16 + $0x750] sm:$0xff] %v1920_v24  ;;  %3074 = vst [vmem:[%s4639_s16 + $0x760] sm:$0xff] %v2033_v25  ;;  %v1922_v29 = vadd.f32 %v1921_v26, %v4624_v4  ;;  %v2035_v30 = vadd.f32 %v2034_v27, %v4629_v5 }
 0x24d   : > { %v1925_v34 = vpop.f32.mrf.mxu1  ;;  %v2038_v35 = vpop.f32.mrf.mxu0  ;;  %2602 = vmatmul.mubr.bf16.gmra.mxu1 %v4492_v63  ;;  %2715 = vmatmul.mubr.bf16.gmra.mxu0 %v4492_v63 }
 0x24e   : > { %3073 = vst [vmem:[%s4639_s16 + $0x758] sm:$0xff] %v1922_v29  ;;  %3075 = vst [vmem:[%s4639_s16 + $0x768] sm:$0xff] %v2035_v30  ;;  %v1926_v36 = vadd.f32 %v1925_v34, %v4615_v14  ;;  %v2039_v38 = vadd.f32 %v2038_v35, %v4620_v0  ;;  %3534 = vmatprep.mubr.msk.bf16.mxu1 %vm1741_vm1, %v4388_v28 }
 0x24f   : > { %v1927_v42 = vpop.f32.mrf.mxu1  ;;  %v2040_v43 = vpop.f32.mrf.mxu0 }
 0x250   : > { %3090 = vst [vmem:[%s4639_s16 + $0x7e0] sm:$0xff] %v1926_v36  ;;  %3092 = vst [vmem:[%s4639_s16 + $0x7f0] sm:$0xff] %v2039_v38  ;;  %v1928_v44 = vadd.f32 %v1927_v42, %v4624_v4  ;;  %v2041_v45 = vadd.f32 %v2040_v43, %v4629_v5 }
 0x251   : > { %v1929_v51 = vpop.f32.mrf.mxu1  ;;  %v2042_v28 = vpop.f32.mrf.mxu0 }
 0x252   : > { %3091 = vst [vmem:[%s4639_s16 + $0x7e8] sm:$0xff] %v1928_v44  ;;  %3093 = vst [vmem:[%s4639_s16 + $0x7f8] sm:$0xff] %v2041_v45  ;;  %v1930_v52 = vadd.f32 %v1929_v51, %v4615_v14  ;;  %v2043_v54 = vadd.f32 %v2042_v28, %v4620_v0 }
 0x253   : > { %v1931_v57 = vpop.f32.mrf.mxu1  ;;  %v2044_v58 = vpop.f32.mrf.mxu0 }
 0x254   : > { %3108 = vst [vmem:[%s4639_s16 + $0x870] sm:$0xff] %v1930_v52  ;;  %3110 = vst [vmem:[%s4639_s16 + $0x880] sm:$0xff] %v2043_v54  ;;  %v1932_v14 = vadd.f32 %v1931_v57, %v4624_v4  ;;  %v2045_v0 = vadd.f32 %v2044_v58, %v4629_v5 }
 0x255   : > { %v2081_v6 = vpop.f32.mrf.mxu1  ;;  %v2194_v7 = vpop.f32.mrf.mxu0  ;;  %2758 = vmatmul.mubr.bf16.vlgmr.msra.gmra.mxu1 %v4390_v31 }
 0x256   : > { %3109 = vst [vmem:[%s4639_s16 + $0x878] sm:$0xff] %v1932_v14  ;;  %3111 = vst [vmem:[%s4639_s16 + $0x888] sm:$0xff] %v2045_v0  ;;  %v2082_v4 = vadd.f32 %v2081_v6, %v4810_v55  ;;  %v2195_v5 = vadd.f32 %v2194_v7, %v4815_v56  ;;  %3535 = vmatprep.mubr.msk.bf16.mxu1 %vm1741_vm1, %v4402_v50 }
 0x257   : > { %v2083_v12 = vpop.f32.mrf.mxu1  ;;  %v2196_v60 = vpop.f32.mrf.mxu0 }
 0x258   : > { %2842 = vst [vmem:[%s4639_s16 + $0x20] sm:$0xff] %v2082_v4  ;;  %2844 = vst [vmem:[%s4639_s16 + $0x30] sm:$0xff] %v2195_v5  ;;  %v2084_v15 = vadd.f32 %v2083_v12, %v4824_v13  ;;  %v2197_v17 = vadd.f32 %v2196_v60, %v4829_v3 }
 0x259   : > { %v2085_v31 = vpop.f32.mrf.mxu1  ;;  %v2198_v18 = vpop.f32.mrf.mxu0 }
 0x25a   : > { %2843 = vst [vmem:[%s4639_s16 + $0x28] sm:$0xff] %v2084_v15  ;;  %2845 = vst [vmem:[%s4639_s16 + $0x38] sm:$0xff] %v2197_v17  ;;  %v2086_v19 = vadd.f32 %v2085_v31, %v4810_v55  ;;  %v2199_v20 = vadd.f32 %v2198_v18, %v4815_v56 }
 0x25b   : > { %v2087_v50 = vpop.f32.mrf.mxu1  ;;  %v2200_v21 = vpop.f32.mrf.mxu0 }
 0x25c   : > { %2860 = vst [vmem:[%s4639_s16 + $0xb0] sm:$0xff] %v2086_v19  ;;  %2862 = vst [vmem:[%s4639_s16 + $0xc0] sm:$0xff] %v2199_v20  ;;  %v2088_v22 = vadd.f32 %v2087_v50, %v4824_v13  ;;  %v2201_v23 = vadd.f32 %v2200_v21, %v4829_v3 }
 0x25d   : > { %v2091_v24 = vpop.f32.mrf.mxu1  ;;  %v2204_v25 = vpop.f32.mrf.mxu0  ;;  %2768 = vmatmul.mubr.bf16.gmra.mxu1 %v4404_v53 }
 0x25e   : > { %2861 = vst [vmem:[%s4639_s16 + $0xb8] sm:$0xff] %v2088_v22  ;;  %2863 = vst [vmem:[%s4639_s16 + $0xc8] sm:$0xff] %v2201_v23  ;;  %v2092_v26 = vadd.f32 %v2091_v24, %v4810_v55  ;;  %v2205_v27 = vadd.f32 %v2204_v25, %v4815_v56  ;;  %3536 = vmatprep.mubr.msk.bf16.mxu1 %vm1741_vm1, %v4416_v11 }
 0x25f   : > { %v2093_v29 = vpop.f32.mrf.mxu1  ;;  %v2206_v30 = vpop.f32.mrf.mxu0 }
 0x260   : > { %2878 = vst [vmem:[%s4639_s16 + $0x140] sm:$0xff] %v2092_v26  ;;  %2880 = vst [vmem:[%s4639_s16 + $0x150] sm:$0xff] %v2205_v27  ;;  %v2094_v34 = vadd.f32 %v2093_v29, %v4824_v13  ;;  %v2207_v35 = vadd.f32 %v2206_v30, %v4829_v3 }
 0x261   : > { %v2095_v53 = vpop.f32.mrf.mxu1  ;;  %v2208_v36 = vpop.f32.mrf.mxu0 }
 0x262   : > { %2879 = vst [vmem:[%s4639_s16 + $0x148] sm:$0xff] %v2094_v34  ;;  %2881 = vst [vmem:[%s4639_s16 + $0x158] sm:$0xff] %v2207_v35  ;;  %v2096_v38 = vadd.f32 %v2095_v53, %v4810_v55  ;;  %v2209_v42 = vadd.f32 %v2208_v36, %v4815_v56 }
 0x263   : > { %v2097_v11 = vpop.f32.mrf.mxu1  ;;  %v2210_v43 = vpop.f32.mrf.mxu0 }
 0x264   : > { %2896 = vst [vmem:[%s4639_s16 + $0x1d0] sm:$0xff] %v2096_v38  ;;  %2898 = vst [vmem:[%s4639_s16 + $0x1e0] sm:$0xff] %v2209_v42  ;;  %v2098_v44 = vadd.f32 %v2097_v11, %v4824_v13  ;;  %v2211_v45 = vadd.f32 %v2210_v43, %v4829_v3 }
 0x265   : > { %v2101_v51 = vpop.f32.mrf.mxu1  ;;  %v2214_v28 = vpop.f32.mrf.mxu0  ;;  %2778 = vmatmul.mubr.bf16.gmra.mxu1 %v4418_v16 }
 0x266   : > { %2897 = vst [vmem:[%s4639_s16 + $0x1d8] sm:$0xff] %v2098_v44  ;;  %2899 = vst [vmem:[%s4639_s16 + $0x1e8] sm:$0xff] %v2211_v45  ;;  %v2102_v52 = vadd.f32 %v2101_v51, %v4810_v55  ;;  %v2215_v54 = vadd.f32 %v2214_v28, %v4815_v56  ;;  %3537 = vmatprep.mubr.msk.bf16.mxu1 %vm1741_vm1, %v4430_v37 }
 0x267   : > { %v2103_v57 = vpop.f32.mrf.mxu1  ;;  %v2216_v58 = vpop.f32.mrf.mxu0 }
 0x268   : > { %2914 = vst [vmem:[%s4639_s16 + $0x260] sm:$0xff] %v2102_v52  ;;  %2916 = vst [vmem:[%s4639_s16 + $0x270] sm:$0xff] %v2215_v54  ;;  %v2104_v14 = vadd.f32 %v2103_v57, %v4824_v13  ;;  %v2217_v0 = vadd.f32 %v2216_v58, %v4829_v3 }
 0x269   : > { %v2105_v16 = vpop.f32.mrf.mxu1  ;;  %v2218_v6 = vpop.f32.mrf.mxu0 }
 0x26a   : > { %2915 = vst [vmem:[%s4639_s16 + $0x268] sm:$0xff] %v2104_v14  ;;  %2917 = vst [vmem:[%s4639_s16 + $0x278] sm:$0xff] %v2217_v0  ;;  %v2106_v7 = vadd.f32 %v2105_v16, %v4810_v55  ;;  %v2219_v4 = vadd.f32 %v2218_v6, %v4815_v56 }
 0x26b   : > { %v2107_v37 = vpop.f32.mrf.mxu1  ;;  %v2220_v5 = vpop.f32.mrf.mxu0 }
 0x26c   : > { %2932 = vst [vmem:[%s4639_s16 + $0x2f0] sm:$0xff] %v2106_v7  ;;  %2934 = vst [vmem:[%s4639_s16 + $0x300] sm:$0xff] %v2219_v4  ;;  %v2108_v12 = vadd.f32 %v2107_v37, %v4824_v13  ;;  %v2221_v60 = vadd.f32 %v2220_v5, %v4829_v3 }
 0x26d   : > { %v2111_v15 = vpop.f32.mrf.mxu1  ;;  %v2224_v17 = vpop.f32.mrf.mxu0  ;;  %2788 = vmatmul.mubr.bf16.gmra.mxu1 %v4432_v40 }
 0x26e   : > { %2933 = vst [vmem:[%s4639_s16 + $0x2f8] sm:$0xff] %v2108_v12  ;;  %2935 = vst [vmem:[%s4639_s16 + $0x308] sm:$0xff] %v2221_v60  ;;  %v2112_v31 = vadd.f32 %v2111_v15, %v4810_v55  ;;  %v2225_v18 = vadd.f32 %v2224_v17, %v4815_v56  ;;  %3538 = vmatprep.mubr.msk.bf16.mxu1 %vm1741_vm1, %v4444_v1 }
 0x26f   : > { %v2113_v19 = vpop.f32.mrf.mxu1  ;;  %v2226_v20 = vpop.f32.mrf.mxu0 }
 0x270   : > { %2950 = vst [vmem:[%s4639_s16 + $0x380] sm:$0xff] %v2112_v31  ;;  %2952 = vst [vmem:[%s4639_s16 + $0x390] sm:$0xff] %v2225_v18  ;;  %v2114_v50 = vadd.f32 %v2113_v19, %v4824_v13  ;;  %v2227_v21 = vadd.f32 %v2226_v20, %v4829_v3 }
 0x271   : > { %v2115_v40 = vpop.f32.mrf.mxu1  ;;  %v2228_v22 = vpop.f32.mrf.mxu0 }
 0x272   : > { %2951 = vst [vmem:[%s4639_s16 + $0x388] sm:$0xff] %v2114_v50  ;;  %2953 = vst [vmem:[%s4639_s16 + $0x398] sm:$0xff] %v2227_v21  ;;  %v2116_v23 = vadd.f32 %v2115_v40, %v4810_v55  ;;  %v2229_v24 = vadd.f32 %v2228_v22, %v4815_v56 }
 0x273   : > { %v2117_v1 = vpop.f32.mrf.mxu1  ;;  %v2230_v25 = vpop.f32.mrf.mxu0 }
 0x274   : > { %2968 = vst [vmem:[%s4639_s16 + $0x410] sm:$0xff] %v2116_v23  ;;  %2970 = vst [vmem:[%s4639_s16 + $0x420] sm:$0xff] %v2229_v24  ;;  %v2118_v26 = vadd.f32 %v2117_v1, %v4824_v13  ;;  %v2231_v27 = vadd.f32 %v2230_v25, %v4829_v3 }
 0x275   : > { %v2121_v29 = vpop.f32.mrf.mxu1  ;;  %v2234_v30 = vpop.f32.mrf.mxu0  ;;  %2798 = vmatmul.mubr.bf16.gmra.mxu1 %v4446_v2 }
 0x276   : > { %2969 = vst [vmem:[%s4639_s16 + $0x418] sm:$0xff] %v2118_v26  ;;  %2971 = vst [vmem:[%s4639_s16 + $0x428] sm:$0xff] %v2231_v27  ;;  %v2122_v34 = vadd.f32 %v2121_v29, %v4810_v55  ;;  %v2235_v35 = vadd.f32 %v2234_v30, %v4815_v56  ;;  %3539 = vmatprep.mubr.msk.bf16.mxu1 %vm1741_vm1, %v4462_v32 }
 0x277   : > { %v2123_v53 = vpop.f32.mrf.mxu1  ;;  %v2236_v36 = vpop.f32.mrf.mxu0 }
 0x278   : > { %2986 = vst [vmem:[%s4639_s16 + $0x4a0] sm:$0xff] %v2122_v34  ;;  %2988 = vst [vmem:[%s4639_s16 + $0x4b0] sm:$0xff] %v2235_v35  ;;  %v2124_v38 = vadd.f32 %v2123_v53, %v4824_v13  ;;  %v2237_v42 = vadd.f32 %v2236_v36, %v4829_v3  ;;  %v4969_v53 = vld [vmem:[#allocation8 + $0x8] sm:$0xff] }
 0x279   : > { %v2125_v2 = vpop.f32.mrf.mxu1  ;;  %v2238_v11 = vpop.f32.mrf.mxu0 }
 0x27a   : > { %2987 = vst [vmem:[%s4639_s16 + $0x4a8] sm:$0xff] %v2124_v38  ;;  %2989 = vst [vmem:[%s4639_s16 + $0x4b8] sm:$0xff] %v2237_v42  ;;  %v2126_v43 = vadd.f32 %v2125_v2, %v4810_v55  ;;  %v2239_v44 = vadd.f32 %v2238_v11, %v4815_v56 }
 0x27b   : > { %v2127_v32 = vpop.f32.mrf.mxu1  ;;  %v2240_v45 = vpop.f32.mrf.mxu0 }
 0x27c   : > { %3004 = vst [vmem:[%s4639_s16 + $0x530] sm:$0xff] %v2126_v43  ;;  %3006 = vst [vmem:[%s4639_s16 + $0x540] sm:$0xff] %v2239_v44  ;;  %v2128_v51 = vadd.f32 %v2127_v32, %v4824_v13  ;;  %v2241_v28 = vadd.f32 %v2240_v45, %v4829_v3  ;;  %v4981_v43 = vrot.slane %v4969_v53, %v4376_v10 }
 0x27d   : > { %v2131_v52 = vpop.f32.mrf.mxu1  ;;  %v2244_v54 = vpop.f32.mrf.mxu0  ;;  %2808 = vmatmul.mubr.bf16.gmra.mxu1 %v4464_v33  ;;  %v4986_v44 = vrot.slane %v4969_v53, %v806_v59  ;;  %v4999_v59 = vrot.slane %v4969_v53, %v810_v61 }
 0x27e   : > { %3005 = vst [vmem:[%s4639_s16 + $0x538] sm:$0xff] %v2128_v51  ;;  %3007 = vst [vmem:[%s4639_s16 + $0x548] sm:$0xff] %v2241_v28  ;;  %v2132_v57 = vadd.f32 %v2131_v52, %v4810_v55  ;;  %v2245_v58 = vadd.f32 %v2244_v54, %v4815_v56  ;;  %3540 = vmatprep.mubr.msk.bf16.mxu1 %vm1741_vm1, %v4476_v48 }
 0x27f   : > { %v2133_v14 = vpop.f32.mrf.mxu1  ;;  %v2246_v0 = vpop.f32.mrf.mxu0 }
 0x280   : > { %3022 = vst [vmem:[%s4639_s16 + $0x5c0] sm:$0xff] %v2132_v57  ;;  %3024 = vst [vmem:[%s4639_s16 + $0x5d0] sm:$0xff] %v2245_v58  ;;  %v2134_v16 = vadd.f32 %v2133_v14, %v4824_v13  ;;  %v2247_v6 = vadd.f32 %v2246_v0, %v4829_v3 }
 0x281   : > { %v2135_v33 = vpop.f32.mrf.mxu1  ;;  %v2248_v7 = vpop.f32.mrf.mxu0 }
 0x282   : > { %3023 = vst [vmem:[%s4639_s16 + $0x5c8] sm:$0xff] %v2134_v16  ;;  %3025 = vst [vmem:[%s4639_s16 + $0x5d8] sm:$0xff] %v2247_v6  ;;  %v2136_v4 = vadd.f32 %v2135_v33, %v4810_v55  ;;  %v2249_v37 = vadd.f32 %v2248_v7, %v4815_v56 }
 0x283   : > { %v2137_v48 = vpop.f32.mrf.mxu1  ;;  %v2250_v5 = vpop.f32.mrf.mxu0 }
 0x284   : > { %3040 = vst [vmem:[%s4639_s16 + $0x650] sm:$0xff] %v2136_v4  ;;  %3042 = vst [vmem:[%s4639_s16 + $0x660] sm:$0xff] %v2249_v37  ;;  %v2138_v12 = vadd.f32 %v2137_v48, %v4824_v13  ;;  %v2251_v60 = vadd.f32 %v2250_v5, %v4829_v3 }
 0x285   : > { %v2141_v15 = vpop.f32.mrf.mxu1  ;;  %v2254_v17 = vpop.f32.mrf.mxu0  ;;  %2818 = vmatmul.mubr.bf16.gmra.mxu1 %v4478_v49 }
 0x286   : > { %3041 = vst [vmem:[%s4639_s16 + $0x658] sm:$0xff] %v2138_v12  ;;  %3043 = vst [vmem:[%s4639_s16 + $0x668] sm:$0xff] %v2251_v60  ;;  %v2142_v31 = vadd.f32 %v2141_v15, %v4810_v55  ;;  %v2255_v18 = vadd.f32 %v2254_v17, %v4815_v56  ;;  %3541 = vmatprep.mubr.msk.bf16.mxu1 %vm1741_vm1, %v4490_v62 }
 0x287   : > { %v2143_v19 = vpop.f32.mrf.mxu1  ;;  %v2256_v20 = vpop.f32.mrf.mxu0 }
 0x288   : > { %3058 = vst [vmem:[%s4639_s16 + $0x6e0] sm:$0xff] %v2142_v31  ;;  %3060 = vst [vmem:[%s4639_s16 + $0x6f0] sm:$0xff] %v2255_v18  ;;  %v2144_v50 = vadd.f32 %v2143_v19, %v4824_v13  ;;  %v2257_v21 = vadd.f32 %v2256_v20, %v4829_v3 }
 0x289   : > { %v2145_v49 = vpop.f32.mrf.mxu1  ;;  %v2258_v40 = vpop.f32.mrf.mxu0 }
 0x28a   : > { %3059 = vst [vmem:[%s4639_s16 + $0x6e8] sm:$0xff] %v2144_v50  ;;  %3061 = vst [vmem:[%s4639_s16 + $0x6f8] sm:$0xff] %v2257_v21  ;;  %v2146_v22 = vadd.f32 %v2145_v49, %v4810_v55  ;;  %v2259_v23 = vadd.f32 %v2258_v40, %v4815_v56 }
 0x28b   : > { %v2147_v62 = vpop.f32.mrf.mxu1  ;;  %v2260_v24 = vpop.f32.mrf.mxu0 }
 0x28c   : > { %3076 = vst [vmem:[%s4639_s16 + $0x770] sm:$0xff] %v2146_v22  ;;  %3078 = vst [vmem:[%s4639_s16 + $0x780] sm:$0xff] %v2259_v23  ;;  %v2148_v1 = vadd.f32 %v2147_v62, %v4824_v13  ;;  %v2261_v25 = vadd.f32 %v2260_v24, %v4829_v3 }
 0x28d   : > { %v2151_v26 = vpop.f32.mrf.mxu1  ;;  %v2264_v27 = vpop.f32.mrf.mxu0  ;;  %2828 = vmatmul.mubr.bf16.gmra.mxu1 %v4492_v63 }
 0x28e   : > { %3077 = vst [vmem:[%s4639_s16 + $0x778] sm:$0xff] %v2148_v1  ;;  %3079 = vst [vmem:[%s4639_s16 + $0x788] sm:$0xff] %v2261_v25  ;;  %v2152_v29 = vadd.f32 %v2151_v26, %v4810_v55  ;;  %v2265_v30 = vadd.f32 %v2264_v27, %v4815_v56 }
 0x28f   : > { %v2153_v34 = vpop.f32.mrf.mxu1  ;;  %v2266_v35 = vpop.f32.mrf.mxu0 }
 0x290   : > { %3094 = vst [vmem:[%s4639_s16 + $0x800] sm:$0xff] %v2152_v29  ;;  %3096 = vst [vmem:[%s4639_s16 + $0x810] sm:$0xff] %v2265_v30  ;;  %v2154_v36 = vadd.f32 %v2153_v34, %v4824_v13  ;;  %v2267_v38 = vadd.f32 %v2266_v35, %v4829_v3 }
 0x291   : > { %v2155_v42 = vpop.f32.mrf.mxu1  ;;  %v2268_v63 = vpop.f32.mrf.mxu0 }
 0x292   : > { %3095 = vst [vmem:[%s4639_s16 + $0x808] sm:$0xff] %v2154_v36  ;;  %3097 = vst [vmem:[%s4639_s16 + $0x818] sm:$0xff] %v2267_v38  ;;  %v2156_v2 = vadd.f32 %v2155_v42, %v4810_v55  ;;  %v2269_v11 = vadd.f32 %v2268_v63, %v4815_v56  ;;  %v4994_v56 = vrot.slane %v4969_v53, %v4373_v9 }
 0x293   : > { %v2157_v32 = vpop.f32.mrf.mxu1  ;;  %v2270_v45 = vpop.f32.mrf.mxu0 }
 0x294   : > { %3112 = vst [vmem:[%s4639_s16 + $0x890] sm:$0xff] %v2156_v2  ;;  %3114 = vst [vmem:[%s4639_s16 + $0x8a0] sm:$0xff] %v2269_v11  ;;  %v2158_v51 = vadd.f32 %v2157_v32, %v4824_v13  ;;  %v2271_v55 = vadd.f32 %v2270_v45, %v4829_v3 }
 0x295   : > { %v2307_v28 = vpop.f32.mrf.mxu1  ;;  %v2420_v52 = vpop.f32.mrf.mxu0 }
 0x296   : > { %3113 = vst [vmem:[%s4639_s16 + $0x898] sm:$0xff] %v2158_v51  ;;  %3115 = vst [vmem:[%s4639_s16 + $0x8a8] sm:$0xff] %v2271_v55  ;;  %v2308_v54 = vadd.f32 %v2307_v28, %v4981_v43  ;;  %v2421_v13 = vadd.f32 %v2420_v52, %v4986_v44 }
 0x297   : > { %v2309_v3 = vpop.f32.mrf.mxu1  ;;  %v2422_v57 = vpop.f32.mrf.mxu0 }
 0x298   : > { %2846 = vst [vmem:[%s4639_s16 + $0x40] sm:$0xff] %v2308_v54  ;;  %2848 = vst [vmem:[%s4639_s16 + $0x50] sm:$0xff] %v2421_v13  ;;  %v2310_v58 = vadd.f32 %v2309_v3, %v4994_v56  ;;  %v2423_v61 = vadd.f32 %v2422_v57, %v4999_v59 }
 0x299   : > { %v2311_v14 = vpop.f32.mrf.mxu1  ;;  %v2424_v0 = vpop.f32.mrf.mxu0 }
 0x29a   : > { %2847 = vst [vmem:[%s4639_s16 + $0x48] sm:$0xff] %v2310_v58  ;;  %2849 = vst [vmem:[%s4639_s16 + $0x58] sm:$0xff] %v2423_v61  ;;  %v2312_v16 = vadd.f32 %v2311_v14, %v4981_v43  ;;  %v2425_v6 = vadd.f32 %v2424_v0, %v4986_v44 }
 0x29b   : > { %v2313_v33 = vpop.f32.mrf.mxu1  ;;  %v2426_v7 = vpop.f32.mrf.mxu0 }
 0x29c   : > { %2864 = vst [vmem:[%s4639_s16 + $0xd0] sm:$0xff] %v2312_v16  ;;  %2866 = vst [vmem:[%s4639_s16 + $0xe0] sm:$0xff] %v2425_v6  ;;  %v2314_v4 = vadd.f32 %v2313_v33, %v4994_v56  ;;  %v2427_v37 = vadd.f32 %v2426_v7, %v4999_v59 }
 0x29d   : > { %v2317_v48 = vpop.f32.mrf.mxu1  ;;  %v2430_v5 = vpop.f32.mrf.mxu0 }
 0x29e   : > { %2865 = vst [vmem:[%s4639_s16 + $0xd8] sm:$0xff] %v2314_v4  ;;  %2867 = vst [vmem:[%s4639_s16 + $0xe8] sm:$0xff] %v2427_v37  ;;  %v2318_v12 = vadd.f32 %v2317_v48, %v4981_v43  ;;  %v2431_v60 = vadd.f32 %v2430_v5, %v4986_v44 }
 0x29f   : > { %v2319_v15 = vpop.f32.mrf.mxu1  ;;  %v2432_v17 = vpop.f32.mrf.mxu0 }
 0x2a0   : > { %2882 = vst [vmem:[%s4639_s16 + $0x160] sm:$0xff] %v2318_v12  ;;  %2884 = vst [vmem:[%s4639_s16 + $0x170] sm:$0xff] %v2431_v60  ;;  %v2320_v31 = vadd.f32 %v2319_v15, %v4994_v56  ;;  %v2433_v18 = vadd.f32 %v2432_v17, %v4999_v59 }
 0x2a1   : > { %v2321_v19 = vpop.f32.mrf.mxu1  ;;  %v2434_v20 = vpop.f32.mrf.mxu0 }
 0x2a2   : > { %2883 = vst [vmem:[%s4639_s16 + $0x168] sm:$0xff] %v2320_v31  ;;  %2885 = vst [vmem:[%s4639_s16 + $0x178] sm:$0xff] %v2433_v18  ;;  %v2322_v50 = vadd.f32 %v2321_v19, %v4981_v43  ;;  %v2435_v21 = vadd.f32 %v2434_v20, %v4986_v44 }
 0x2a3   : > { %v2323_v49 = vpop.f32.mrf.mxu1  ;;  %v2436_v40 = vpop.f32.mrf.mxu0 }
 0x2a4   : > { %2900 = vst [vmem:[%s4639_s16 + $0x1f0] sm:$0xff] %v2322_v50  ;;  %2902 = vst [vmem:[%s4639_s16 + $0x200] sm:$0xff] %v2435_v21  ;;  %v2324_v22 = vadd.f32 %v2323_v49, %v4994_v56  ;;  %v2437_v23 = vadd.f32 %v2436_v40, %v4999_v59 }
 0x2a5   : > { %v2327_v62 = vpop.f32.mrf.mxu1  ;;  %v2440_v24 = vpop.f32.mrf.mxu0 }
 0x2a6   : > { %2901 = vst [vmem:[%s4639_s16 + $0x1f8] sm:$0xff] %v2324_v22  ;;  %2903 = vst [vmem:[%s4639_s16 + $0x208] sm:$0xff] %v2437_v23  ;;  %v2328_v1 = vadd.f32 %v2327_v62, %v4981_v43  ;;  %v2441_v25 = vadd.f32 %v2440_v24, %v4986_v44 }
 0x2a7   : > { %v2329_v26 = vpop.f32.mrf.mxu1  ;;  %v2442_v27 = vpop.f32.mrf.mxu0 }
 0x2a8   : > { %2918 = vst [vmem:[%s4639_s16 + $0x280] sm:$0xff] %v2328_v1  ;;  %2920 = vst [vmem:[%s4639_s16 + $0x290] sm:$0xff] %v2441_v25  ;;  %v2330_v29 = vadd.f32 %v2329_v26, %v4994_v56  ;;  %v2443_v30 = vadd.f32 %v2442_v27, %v4999_v59 }
 0x2a9   : > { %v2331_v34 = vpop.f32.mrf.mxu1  ;;  %v2444_v35 = vpop.f32.mrf.mxu0 }
 0x2aa   : > { %2919 = vst [vmem:[%s4639_s16 + $0x288] sm:$0xff] %v2330_v29  ;;  %2921 = vst [vmem:[%s4639_s16 + $0x298] sm:$0xff] %v2443_v30  ;;  %v2332_v36 = vadd.f32 %v2331_v34, %v4981_v43  ;;  %v2445_v38 = vadd.f32 %v2444_v35, %v4986_v44 }
 0x2ab   : > { %v2333_v42 = vpop.f32.mrf.mxu1  ;;  %v2446_v63 = vpop.f32.mrf.mxu0 }
 0x2ac   : > { %2936 = vst [vmem:[%s4639_s16 + $0x310] sm:$0xff] %v2332_v36  ;;  %2938 = vst [vmem:[%s4639_s16 + $0x320] sm:$0xff] %v2445_v38  ;;  %v2334_v2 = vadd.f32 %v2333_v42, %v4994_v56  ;;  %v2447_v11 = vadd.f32 %v2446_v63, %v4999_v59 }
 0x2ad   : > { %v2337_v32 = vpop.f32.mrf.mxu1  ;;  %v2450_v45 = vpop.f32.mrf.mxu0 }
 0x2ae   : > { %2937 = vst [vmem:[%s4639_s16 + $0x318] sm:$0xff] %v2334_v2  ;;  %2939 = vst [vmem:[%s4639_s16 + $0x328] sm:$0xff] %v2447_v11  ;;  %v2338_v51 = vadd.f32 %v2337_v32, %v4981_v43  ;;  %v2451_v55 = vadd.f32 %v2450_v45, %v4986_v44 }
 0x2af   : > { %v2339_v28 = vpop.f32.mrf.mxu1  ;;  %v2452_v52 = vpop.f32.mrf.mxu0 }
 0x2b0   : > { %2954 = vst [vmem:[%s4639_s16 + $0x3a0] sm:$0xff] %v2338_v51  ;;  %2956 = vst [vmem:[%s4639_s16 + $0x3b0] sm:$0xff] %v2451_v55  ;;  %v2340_v54 = vadd.f32 %v2339_v28, %v4994_v56  ;;  %v2453_v13 = vadd.f32 %v2452_v52, %v4999_v59 }
 0x2b1   : > { %v2341_v3 = vpop.f32.mrf.mxu1  ;;  %v2454_v57 = vpop.f32.mrf.mxu0 }
 0x2b2   : > { %2955 = vst [vmem:[%s4639_s16 + $0x3a8] sm:$0xff] %v2340_v54  ;;  %2957 = vst [vmem:[%s4639_s16 + $0x3b8] sm:$0xff] %v2453_v13  ;;  %v2342_v58 = vadd.f32 %v2341_v3, %v4981_v43  ;;  %v2455_v61 = vadd.f32 %v2454_v57, %v4986_v44 }
 0x2b3   : > { %v2343_v14 = vpop.f32.mrf.mxu1  ;;  %v2456_v0 = vpop.f32.mrf.mxu0 }
 0x2b4   : > { %2972 = vst [vmem:[%s4639_s16 + $0x430] sm:$0xff] %v2342_v58  ;;  %2974 = vst [vmem:[%s4639_s16 + $0x440] sm:$0xff] %v2455_v61  ;;  %v2344_v16 = vadd.f32 %v2343_v14, %v4994_v56  ;;  %v2457_v6 = vadd.f32 %v2456_v0, %v4999_v59 }
 0x2b5   : > { %v2347_v33 = vpop.f32.mrf.mxu1  ;;  %v2460_v7 = vpop.f32.mrf.mxu0 }
 0x2b6   : > { %2973 = vst [vmem:[%s4639_s16 + $0x438] sm:$0xff] %v2344_v16  ;;  %2975 = vst [vmem:[%s4639_s16 + $0x448] sm:$0xff] %v2457_v6  ;;  %v2348_v4 = vadd.f32 %v2347_v33, %v4981_v43  ;;  %v2461_v37 = vadd.f32 %v2460_v7, %v4986_v44 }
 0x2b7   : > { %v2349_v48 = vpop.f32.mrf.mxu1  ;;  %v2462_v5 = vpop.f32.mrf.mxu0 }
 0x2b8   : > { %2990 = vst [vmem:[%s4639_s16 + $0x4c0] sm:$0xff] %v2348_v4  ;;  %2992 = vst [vmem:[%s4639_s16 + $0x4d0] sm:$0xff] %v2461_v37  ;;  %v2350_v12 = vadd.f32 %v2349_v48, %v4994_v56  ;;  %v2463_v60 = vadd.f32 %v2462_v5, %v4999_v59 }
 0x2b9   : > { %v2351_v15 = vpop.f32.mrf.mxu1  ;;  %v2464_v17 = vpop.f32.mrf.mxu0 }
 0x2ba   : > { %2991 = vst [vmem:[%s4639_s16 + $0x4c8] sm:$0xff] %v2350_v12  ;;  %2993 = vst [vmem:[%s4639_s16 + $0x4d8] sm:$0xff] %v2463_v60  ;;  %v2352_v31 = vadd.f32 %v2351_v15, %v4981_v43  ;;  %v2465_v18 = vadd.f32 %v2464_v17, %v4986_v44  ;;  %v5128_v15 = vrot.slane %v4969_v53, %v814_v39 }
 0x2bb   : > { %v2353_v19 = vpop.f32.mrf.mxu1  ;;  %v2466_v20 = vpop.f32.mrf.mxu0  ;;  %v5133_v17 = vrot.slane %v4969_v53, %v822_v41  ;;  %v5142_v39 = vrot.slane %v4969_v53, %v818_v46  ;;  %v5147_v41 = vrot.slane %v4969_v53, %v826_v47 }
 0x2bc   : > { %3008 = vst [vmem:[%s4639_s16 + $0x550] sm:$0xff] %v2352_v31  ;;  %3010 = vst [vmem:[%s4639_s16 + $0x560] sm:$0xff] %v2465_v18  ;;  %v2354_v50 = vadd.f32 %v2353_v19, %v4994_v56  ;;  %v2467_v21 = vadd.f32 %v2466_v20, %v4999_v59 }
 0x2bd   : > { %v2357_v49 = vpop.f32.mrf.mxu1  ;;  %v2470_v40 = vpop.f32.mrf.mxu0 }
 0x2be   : > { %3009 = vst [vmem:[%s4639_s16 + $0x558] sm:$0xff] %v2354_v50  ;;  %3011 = vst [vmem:[%s4639_s16 + $0x568] sm:$0xff] %v2467_v21  ;;  %v2358_v22 = vadd.f32 %v2357_v49, %v4981_v43  ;;  %v2471_v23 = vadd.f32 %v2470_v40, %v4986_v44 }
 0x2bf   : > { %v2359_v62 = vpop.f32.mrf.mxu1  ;;  %v2472_v24 = vpop.f32.mrf.mxu0 }
 0x2c0   : > { %3026 = vst [vmem:[%s4639_s16 + $0x5e0] sm:$0xff] %v2358_v22  ;;  %3028 = vst [vmem:[%s4639_s16 + $0x5f0] sm:$0xff] %v2471_v23  ;;  %v2360_v1 = vadd.f32 %v2359_v62, %v4994_v56  ;;  %v2473_v25 = vadd.f32 %v2472_v24, %v4999_v59 }
 0x2c1   : > { %v2361_v26 = vpop.f32.mrf.mxu1  ;;  %v2474_v27 = vpop.f32.mrf.mxu0 }
 0x2c2   : > { %3027 = vst [vmem:[%s4639_s16 + $0x5e8] sm:$0xff] %v2360_v1  ;;  %3029 = vst [vmem:[%s4639_s16 + $0x5f8] sm:$0xff] %v2473_v25  ;;  %v2362_v29 = vadd.f32 %v2361_v26, %v4981_v43  ;;  %v2475_v30 = vadd.f32 %v2474_v27, %v4986_v44 }
 0x2c3   : > { %v2363_v34 = vpop.f32.mrf.mxu1  ;;  %v2476_v35 = vpop.f32.mrf.mxu0 }
 0x2c4   : > { %3044 = vst [vmem:[%s4639_s16 + $0x670] sm:$0xff] %v2362_v29  ;;  %3046 = vst [vmem:[%s4639_s16 + $0x680] sm:$0xff] %v2475_v30  ;;  %v2364_v36 = vadd.f32 %v2363_v34, %v4994_v56  ;;  %v2477_v38 = vadd.f32 %v2476_v35, %v4999_v59 }
 0x2c5   : > { %v2367_v42 = vpop.f32.mrf.mxu1  ;;  %v2480_v63 = vpop.f32.mrf.mxu0 }
 0x2c6   : > { %3045 = vst [vmem:[%s4639_s16 + $0x678] sm:$0xff] %v2364_v36  ;;  %3047 = vst [vmem:[%s4639_s16 + $0x688] sm:$0xff] %v2477_v38  ;;  %v2368_v2 = vadd.f32 %v2367_v42, %v4981_v43  ;;  %v2481_v11 = vadd.f32 %v2480_v63, %v4986_v44 }
 0x2c7   : > { %v2369_v32 = vpop.f32.mrf.mxu1  ;;  %v2482_v45 = vpop.f32.mrf.mxu0 }
 0x2c8   : > { %3062 = vst [vmem:[%s4639_s16 + $0x700] sm:$0xff] %v2368_v2  ;;  %3064 = vst [vmem:[%s4639_s16 + $0x710] sm:$0xff] %v2481_v11  ;;  %v2370_v51 = vadd.f32 %v2369_v32, %v4994_v56  ;;  %v2483_v55 = vadd.f32 %v2482_v45, %v4999_v59 }
 0x2c9   : > { %v2371_v28 = vpop.f32.mrf.mxu1  ;;  %v2484_v52 = vpop.f32.mrf.mxu0 }
 0x2ca   : > { %3063 = vst [vmem:[%s4639_s16 + $0x708] sm:$0xff] %v2370_v51  ;;  %3065 = vst [vmem:[%s4639_s16 + $0x718] sm:$0xff] %v2483_v55  ;;  %v2372_v54 = vadd.f32 %v2371_v28, %v4981_v43  ;;  %v2485_v13 = vadd.f32 %v2484_v52, %v4986_v44 }
 0x2cb   : > { %v2373_v3 = vpop.f32.mrf.mxu1  ;;  %v2486_v57 = vpop.f32.mrf.mxu0 }
 0x2cc   : > { %3080 = vst [vmem:[%s4639_s16 + $0x790] sm:$0xff] %v2372_v54  ;;  %3082 = vst [vmem:[%s4639_s16 + $0x7a0] sm:$0xff] %v2485_v13  ;;  %v2374_v58 = vadd.f32 %v2373_v3, %v4994_v56  ;;  %v2487_v61 = vadd.f32 %v2486_v57, %v4999_v59 }
 0x2cd   : > { %v2377_v14 = vpop.f32.mrf.mxu1  ;;  %v2490_v0 = vpop.f32.mrf.mxu0 }
 0x2ce   : > { %3081 = vst [vmem:[%s4639_s16 + $0x798] sm:$0xff] %v2374_v58  ;;  %3083 = vst [vmem:[%s4639_s16 + $0x7a8] sm:$0xff] %v2487_v61  ;;  %v2378_v16 = vadd.f32 %v2377_v14, %v4981_v43  ;;  %v2491_v6 = vadd.f32 %v2490_v0, %v4986_v44 }
 0x2cf   : > { %v2379_v33 = vpop.f32.mrf.mxu1  ;;  %v2492_v7 = vpop.f32.mrf.mxu0 }
 0x2d0   : > { %3098 = vst [vmem:[%s4639_s16 + $0x820] sm:$0xff] %v2378_v16  ;;  %3100 = vst [vmem:[%s4639_s16 + $0x830] sm:$0xff] %v2491_v6  ;;  %v2380_v4 = vadd.f32 %v2379_v33, %v4994_v56  ;;  %v2493_v37 = vadd.f32 %v2492_v7, %v4999_v59 }
 0x2d1   : > { %v2381_v48 = vpop.f32.mrf.mxu1  ;;  %v2494_v5 = vpop.f32.mrf.mxu0 }
 0x2d2   : > { %3099 = vst [vmem:[%s4639_s16 + $0x828] sm:$0xff] %v2380_v4  ;;  %3101 = vst [vmem:[%s4639_s16 + $0x838] sm:$0xff] %v2493_v37  ;;  %v2382_v12 = vadd.f32 %v2381_v48, %v4981_v43  ;;  %v2495_v60 = vadd.f32 %v2494_v5, %v4986_v44 }
 0x2d3   : > { %v2383_v31 = vpop.f32.mrf.mxu1  ;;  %v2496_v18 = vpop.f32.mrf.mxu0 }
 0x2d4   : > { %3116 = vst [vmem:[%s4639_s16 + $0x8b0] sm:$0xff] %v2382_v12  ;;  %3118 = vst [vmem:[%s4639_s16 + $0x8c0] sm:$0xff] %v2495_v60  ;;  %v2384_v43 = vadd.f32 %v2383_v31, %v4994_v56  ;;  %v2497_v44 = vadd.f32 %v2496_v18, %v4999_v59 }
 0x2d5   : > { %v2533_v19 = vpop.f32.mrf.mxu1  ;;  %v2646_v20 = vpop.f32.mrf.mxu0 }
 0x2d6   : > { %3117 = vst [vmem:[%s4639_s16 + $0x8b8] sm:$0xff] %v2384_v43  ;;  %3119 = vst [vmem:[%s4639_s16 + $0x8c8] sm:$0xff] %v2497_v44  ;;  %v2534_v56 = vadd.f32 %v2533_v19, %v5128_v15  ;;  %v2647_v59 = vadd.f32 %v2646_v20, %v5133_v17 }
 0x2d7   : > { %v2535_v50 = vpop.f32.mrf.mxu1  ;;  %v2648_v46 = vpop.f32.mrf.mxu0 }
 0x2d8   : > { %2850 = vst [vmem:[%s4639_s16 + $0x60] sm:$0xff] %v2534_v56  ;;  %2852 = vst [vmem:[%s4639_s16 + $0x70] sm:$0xff] %v2647_v59  ;;  %v2536_v8 = vadd.f32 %v2535_v50, %v5142_v39  ;;  %v2649_v47 = vadd.f32 %v2648_v46, %v5147_v41 }
 0x2d9   : > { %v2537_v53 = vpop.f32.mrf.mxu1  ;;  %v2650_v21 = vpop.f32.mrf.mxu0 }
 0x2da   : > { %2851 = vst [vmem:[%s4639_s16 + $0x68] sm:$0xff] %v2536_v8  ;;  %2853 = vst [vmem:[%s4639_s16 + $0x78] sm:$0xff] %v2649_v47  ;;  %v2538_v49 = vadd.f32 %v2537_v53, %v5128_v15  ;;  %v2651_v40 = vadd.f32 %v2650_v21, %v5133_v17 }
 0x2db   : > { %v2539_v22 = vpop.f32.mrf.mxu1  ;;  %v2652_v23 = vpop.f32.mrf.mxu0 }
 0x2dc   : > { %2868 = vst [vmem:[%s4639_s16 + $0xf0] sm:$0xff] %v2538_v49  ;;  %2870 = vst [vmem:[%s4639_s16 + $0x100] sm:$0xff] %v2651_v40  ;;  %v2540_v62 = vadd.f32 %v2539_v22, %v5142_v39  ;;  %v2653_v24 = vadd.f32 %v2652_v23, %v5147_v41 }
 0x2dd   : > { %v2543_v1 = vpop.f32.mrf.mxu1  ;;  %v2656_v25 = vpop.f32.mrf.mxu0 }
 0x2de   : > { %2869 = vst [vmem:[%s4639_s16 + $0xf8] sm:$0xff] %v2540_v62  ;;  %2871 = vst [vmem:[%s4639_s16 + $0x108] sm:$0xff] %v2653_v24  ;;  %v2544_v26 = vadd.f32 %v2543_v1, %v5128_v15  ;;  %v2657_v27 = vadd.f32 %v2656_v25, %v5133_v17 }
 0x2df   : > { %v2545_v29 = vpop.f32.mrf.mxu1  ;;  %v2658_v30 = vpop.f32.mrf.mxu0 }
 0x2e0   : > { %2886 = vst [vmem:[%s4639_s16 + $0x180] sm:$0xff] %v2544_v26  ;;  %2888 = vst [vmem:[%s4639_s16 + $0x190] sm:$0xff] %v2657_v27  ;;  %v2546_v34 = vadd.f32 %v2545_v29, %v5142_v39  ;;  %v2659_v35 = vadd.f32 %v2658_v30, %v5147_v41 }
 0x2e1   : > { %v2547_v36 = vpop.f32.mrf.mxu1  ;;  %v2660_v38 = vpop.f32.mrf.mxu0 }
 0x2e2   : > { %2887 = vst [vmem:[%s4639_s16 + $0x188] sm:$0xff] %v2546_v34  ;;  %2889 = vst [vmem:[%s4639_s16 + $0x198] sm:$0xff] %v2659_v35  ;;  %v2548_v42 = vadd.f32 %v2547_v36, %v5128_v15  ;;  %v2661_v63 = vadd.f32 %v2660_v38, %v5133_v17 }
 0x2e3   : > { %v2549_v2 = vpop.f32.mrf.mxu1  ;;  %v2662_v11 = vpop.f32.mrf.mxu0 }
 0x2e4   : > { %2904 = vst [vmem:[%s4639_s16 + $0x210] sm:$0xff] %v2548_v42  ;;  %2906 = vst [vmem:[%s4639_s16 + $0x220] sm:$0xff] %v2661_v63  ;;  %v2550_v32 = vadd.f32 %v2549_v2, %v5142_v39  ;;  %v2663_v45 = vadd.f32 %v2662_v11, %v5147_v41 }
 0x2e5   : > { %v2553_v51 = vpop.f32.mrf.mxu1  ;;  %v2666_v55 = vpop.f32.mrf.mxu0 }
 0x2e6   : > { %2905 = vst [vmem:[%s4639_s16 + $0x218] sm:$0xff] %v2550_v32  ;;  %2907 = vst [vmem:[%s4639_s16 + $0x228] sm:$0xff] %v2663_v45  ;;  %v2554_v28 = vadd.f32 %v2553_v51, %v5128_v15  ;;  %v2667_v52 = vadd.f32 %v2666_v55, %v5133_v17 }
 0x2e7   : > { %v2555_v54 = vpop.f32.mrf.mxu1  ;;  %v2668_v13 = vpop.f32.mrf.mxu0 }
 0x2e8   : > { %2922 = vst [vmem:[%s4639_s16 + $0x2a0] sm:$0xff] %v2554_v28  ;;  %2924 = vst [vmem:[%s4639_s16 + $0x2b0] sm:$0xff] %v2667_v52  ;;  %v2556_v3 = vadd.f32 %v2555_v54, %v5142_v39  ;;  %v2669_v57 = vadd.f32 %v2668_v13, %v5147_v41 }
 0x2e9   : > { %v2557_v58 = vpop.f32.mrf.mxu1  ;;  %v2670_v61 = vpop.f32.mrf.mxu0 }
 0x2ea   : > { %2923 = vst [vmem:[%s4639_s16 + $0x2a8] sm:$0xff] %v2556_v3  ;;  %2925 = vst [vmem:[%s4639_s16 + $0x2b8] sm:$0xff] %v2669_v57  ;;  %v2558_v14 = vadd.f32 %v2557_v58, %v5128_v15  ;;  %v2671_v0 = vadd.f32 %v2670_v61, %v5133_v17 }
 0x2eb   : > { %v2559_v16 = vpop.f32.mrf.mxu1  ;;  %v2672_v6 = vpop.f32.mrf.mxu0 }
 0x2ec   : > { %2940 = vst [vmem:[%s4639_s16 + $0x330] sm:$0xff] %v2558_v14  ;;  %2942 = vst [vmem:[%s4639_s16 + $0x340] sm:$0xff] %v2671_v0  ;;  %v2560_v33 = vadd.f32 %v2559_v16, %v5142_v39  ;;  %v2673_v7 = vadd.f32 %v2672_v6, %v5147_v41 }
 0x2ed   : > { %v2563_v4 = vpop.f32.mrf.mxu1  ;;  %v2676_v37 = vpop.f32.mrf.mxu0 }
 0x2ee   : > { %2941 = vst [vmem:[%s4639_s16 + $0x338] sm:$0xff] %v2560_v33  ;;  %2943 = vst [vmem:[%s4639_s16 + $0x348] sm:$0xff] %v2673_v7  ;;  %v2564_v48 = vadd.f32 %v2563_v4, %v5128_v15  ;;  %v2677_v5 = vadd.f32 %v2676_v37, %v5133_v17 }
 0x2ef   : > { %v2565_v12 = vpop.f32.mrf.mxu1  ;;  %v2678_v60 = vpop.f32.mrf.mxu0 }
 0x2f0   : > { %2958 = vst [vmem:[%s4639_s16 + $0x3c0] sm:$0xff] %v2564_v48  ;;  %2960 = vst [vmem:[%s4639_s16 + $0x3d0] sm:$0xff] %v2677_v5  ;;  %v2566_v31 = vadd.f32 %v2565_v12, %v5142_v39  ;;  %v2679_v18 = vadd.f32 %v2678_v60, %v5147_v41 }
 0x2f1   : > { %v2567_v43 = vpop.f32.mrf.mxu1  ;;  %v2680_v44 = vpop.f32.mrf.mxu0 }
 0x2f2   : > { %2959 = vst [vmem:[%s4639_s16 + $0x3c8] sm:$0xff] %v2566_v31  ;;  %2961 = vst [vmem:[%s4639_s16 + $0x3d8] sm:$0xff] %v2679_v18  ;;  %v2568_v19 = vadd.f32 %v2567_v43, %v5128_v15  ;;  %v2681_v20 = vadd.f32 %v2680_v44, %v5133_v17 }
 0x2f3   : > { %v2569_v56 = vpop.f32.mrf.mxu1  ;;  %v2682_v59 = vpop.f32.mrf.mxu0 }
 0x2f4   : > { %2976 = vst [vmem:[%s4639_s16 + $0x450] sm:$0xff] %v2568_v19  ;;  %2978 = vst [vmem:[%s4639_s16 + $0x460] sm:$0xff] %v2681_v20  ;;  %v2570_v50 = vadd.f32 %v2569_v56, %v5142_v39  ;;  %v2683_v46 = vadd.f32 %v2682_v59, %v5147_v41  ;;  %v792_v56 = vld [vmem:[#allocation8 + $0x10] sm:$0x3] }
 0x2f5   : > { %v2573_v8 = vpop.f32.mrf.mxu1  ;;  %v2686_v47 = vpop.f32.mrf.mxu0 }
 0x2f6   : > { %2977 = vst [vmem:[%s4639_s16 + $0x458] sm:$0xff] %v2570_v50  ;;  %2979 = vst [vmem:[%s4639_s16 + $0x468] sm:$0xff] %v2683_v46  ;;  %v2574_v53 = vadd.f32 %v2573_v8, %v5128_v15  ;;  %v2687_v21 = vadd.f32 %v2686_v47, %v5133_v17 }
 0x2f7   : > { %v2575_v49 = vpop.f32.mrf.mxu1  ;;  %v2688_v40 = vpop.f32.mrf.mxu0 }
 0x2f8   : > { %2994 = vst [vmem:[%s4639_s16 + $0x4e0] sm:$0xff] %v2574_v53  ;;  %2996 = vst [vmem:[%s4639_s16 + $0x4f0] sm:$0xff] %v2687_v21  ;;  %v2576_v22 = vadd.f32 %v2575_v49, %v5142_v39  ;;  %v2689_v23 = vadd.f32 %v2688_v40, %v5147_v41  ;;  %v5274_v21 = vrot.slane %v792_v56, %v4376_v10 }
 0x2f9   : > { %v2577_v62 = vpop.f32.mrf.mxu1  ;;  %v2690_v24 = vpop.f32.mrf.mxu0 }
 0x2fa   : > { %2995 = vst [vmem:[%s4639_s16 + $0x4e8] sm:$0xff] %v2576_v22  ;;  %2997 = vst [vmem:[%s4639_s16 + $0x4f8] sm:$0xff] %v2689_v23  ;;  %v2578_v1 = vadd.f32 %v2577_v62, %v5128_v15  ;;  %v2691_v25 = vadd.f32 %v2690_v24, %v5133_v17  ;;  %v5281_v62 = vrot.slane %v792_v56, %v4373_v9 }
 0x2fb   : > { %v2579_v26 = vpop.f32.mrf.mxu1  ;;  %v2692_v27 = vpop.f32.mrf.mxu0 }
 0x2fc   : > { %3012 = vst [vmem:[%s4639_s16 + $0x570] sm:$0xff] %v2578_v1  ;;  %3014 = vst [vmem:[%s4639_s16 + $0x580] sm:$0xff] %v2691_v25  ;;  %v2580_v29 = vadd.f32 %v2579_v26, %v5142_v39  ;;  %v2693_v30 = vadd.f32 %v2692_v27, %v5147_v41 }
 0x2fd   : > { %v2583_v34 = vpop.f32.mrf.mxu1  ;;  %v2696_v35 = vpop.f32.mrf.mxu0 }
 0x2fe   : > { %3013 = vst [vmem:[%s4639_s16 + $0x578] sm:$0xff] %v2580_v29  ;;  %3015 = vst [vmem:[%s4639_s16 + $0x588] sm:$0xff] %v2693_v30  ;;  %v2584_v36 = vadd.f32 %v2583_v34, %v5128_v15  ;;  %v2697_v38 = vadd.f32 %v2696_v35, %v5133_v17 }
 0x2ff   : > { %v2585_v42 = vpop.f32.mrf.mxu1  ;;  %v2698_v63 = vpop.f32.mrf.mxu0 }
 0x300   : > { %3030 = vst [vmem:[%s4639_s16 + $0x600] sm:$0xff] %v2584_v36  ;;  %3032 = vst [vmem:[%s4639_s16 + $0x610] sm:$0xff] %v2697_v38  ;;  %v2586_v2 = vadd.f32 %v2585_v42, %v5142_v39  ;;  %v2699_v11 = vadd.f32 %v2698_v63, %v5147_v41 }
 0x301   : > { %v2587_v32 = vpop.f32.mrf.mxu1  ;;  %v2700_v45 = vpop.f32.mrf.mxu0 }
 0x302   : > { %3031 = vst [vmem:[%s4639_s16 + $0x608] sm:$0xff] %v2586_v2  ;;  %3033 = vst [vmem:[%s4639_s16 + $0x618] sm:$0xff] %v2699_v11  ;;  %v2588_v51 = vadd.f32 %v2587_v32, %v5128_v15  ;;  %v2701_v55 = vadd.f32 %v2700_v45, %v5133_v17 }
 0x303   : > { %v2589_v28 = vpop.f32.mrf.mxu1  ;;  %v2702_v52 = vpop.f32.mrf.mxu0 }
 0x304   : > { %3048 = vst [vmem:[%s4639_s16 + $0x690] sm:$0xff] %v2588_v51  ;;  %3050 = vst [vmem:[%s4639_s16 + $0x6a0] sm:$0xff] %v2701_v55  ;;  %v2590_v54 = vadd.f32 %v2589_v28, %v5142_v39  ;;  %v2703_v13 = vadd.f32 %v2702_v52, %v5147_v41 }
 0x305   : > { %v2593_v3 = vpop.f32.mrf.mxu1  ;;  %v2706_v57 = vpop.f32.mrf.mxu0 }
 0x306   : > { %3049 = vst [vmem:[%s4639_s16 + $0x698] sm:$0xff] %v2590_v54  ;;  %3051 = vst [vmem:[%s4639_s16 + $0x6a8] sm:$0xff] %v2703_v13  ;;  %v2594_v58 = vadd.f32 %v2593_v3, %v5128_v15  ;;  %v2707_v61 = vadd.f32 %v2706_v57, %v5133_v17 }
 0x307   : > { %v2595_v14 = vpop.f32.mrf.mxu1  ;;  %v2708_v0 = vpop.f32.mrf.mxu0 }
 0x308   : > { %3066 = vst [vmem:[%s4639_s16 + $0x720] sm:$0xff] %v2594_v58  ;;  %3068 = vst [vmem:[%s4639_s16 + $0x730] sm:$0xff] %v2707_v61  ;;  %v2596_v16 = vadd.f32 %v2595_v14, %v5142_v39  ;;  %v2709_v6 = vadd.f32 %v2708_v0, %v5147_v41 }
 0x309   : > { %v2597_v33 = vpop.f32.mrf.mxu1  ;;  %v2710_v7 = vpop.f32.mrf.mxu0 }
 0x30a   : > { %3067 = vst [vmem:[%s4639_s16 + $0x728] sm:$0xff] %v2596_v16  ;;  %3069 = vst [vmem:[%s4639_s16 + $0x738] sm:$0xff] %v2709_v6  ;;  %v2598_v4 = vadd.f32 %v2597_v33, %v5128_v15  ;;  %v2711_v37 = vadd.f32 %v2710_v7, %v5133_v17 }
 0x30b   : > { %v2599_v48 = vpop.f32.mrf.mxu1  ;;  %v2712_v5 = vpop.f32.mrf.mxu0 }
 0x30c   : > { %3084 = vst [vmem:[%s4639_s16 + $0x7b0] sm:$0xff] %v2598_v4  ;;  %3086 = vst [vmem:[%s4639_s16 + $0x7c0] sm:$0xff] %v2711_v37  ;;  %v2600_v12 = vadd.f32 %v2599_v48, %v5142_v39  ;;  %v2713_v60 = vadd.f32 %v2712_v5, %v5147_v41 }
 0x30d   : > { %v2603_v31 = vpop.f32.mrf.mxu1  ;;  %v2716_v18 = vpop.f32.mrf.mxu0 }
 0x30e   : > { %3085 = vst [vmem:[%s4639_s16 + $0x7b8] sm:$0xff] %v2600_v12  ;;  %3087 = vst [vmem:[%s4639_s16 + $0x7c8] sm:$0xff] %v2713_v60  ;;  %v2604_v43 = vadd.f32 %v2603_v31, %v5128_v15  ;;  %v2717_v44 = vadd.f32 %v2716_v18, %v5133_v17 }
 0x30f   : > { %v2605_v19 = vpop.f32.mrf.mxu1  ;;  %v2718_v20 = vpop.f32.mrf.mxu0 }
 0x310   : > { %3102 = vst [vmem:[%s4639_s16 + $0x840] sm:$0xff] %v2604_v43  ;;  %3104 = vst [vmem:[%s4639_s16 + $0x850] sm:$0xff] %v2717_v44  ;;  %v2606_v59 = vadd.f32 %v2605_v19, %v5142_v39  ;;  %v2719_v50 = vadd.f32 %v2718_v20, %v5147_v41 }
 0x311   : > { %v2607_v46 = vpop.f32.mrf.mxu1  ;;  %v2720_v8 = vpop.f32.mrf.mxu0 }
 0x312   : > { %3103 = vst [vmem:[%s4639_s16 + $0x848] sm:$0xff] %v2606_v59  ;;  %3105 = vst [vmem:[%s4639_s16 + $0x858] sm:$0xff] %v2719_v50  ;;  %v2608_v47 = vadd.f32 %v2607_v46, %v5128_v15  ;;  %v2721_v53 = vadd.f32 %v2720_v8, %v5133_v17 }
 0x313   : > { %v2609_v49 = vpop.f32.mrf.mxu1  ;;  %v2722_v40 = vpop.f32.mrf.mxu0 }
 0x314   : > { %3120 = vst [vmem:[%s4639_s16 + $0x8d0] sm:$0xff] %v2608_v47  ;;  %3122 = vst [vmem:[%s4639_s16 + $0x8e0] sm:$0xff] %v2721_v53  ;;  %v2610_v22 = vadd.f32 %v2609_v49, %v5142_v39  ;;  %v2723_v23 = vadd.f32 %v2722_v40, %v5147_v41 }
 0x315   : > { %v2759_v15 = vpop.f32.mrf.mxu1 }
 0x316   : > { %3121 = vst [vmem:[%s4639_s16 + $0x8d8] sm:$0xff] %v2610_v22  ;;  %3123 = vst [vmem:[%s4639_s16 + $0x8e8] sm:$0xff] %v2723_v23  ;;  %v2760_v10 = vadd.f32 %v2759_v15, %v5274_v21 }
 0x317   : > { %v2761_v17 = vpop.f32.mrf.mxu1 }
 0x318   : > { %2854 = vst [vmem:[%s4639_s16 + $0x80] sm:$0xff] %v2760_v10  ;;  %v2762_v24 = vadd.f32 %v2761_v17, %v5281_v62 }
 0x319   : > { %v2763_v1 = vpop.f32.mrf.mxu1 }
 0x31a   : > { %2855 = vst [vmem:[%s4639_s16 + $0x88] sm:$0xff] %v2762_v24  ;;  %v2764_v39 = vadd.f32 %v2763_v1, %v5274_v21 }
 0x31b   : > { %v2765_v41 = vpop.f32.mrf.mxu1 }
 0x31c   : > { %2872 = vst [vmem:[%s4639_s16 + $0x110] sm:$0xff] %v2764_v39  ;;  %v2766_v9 = vadd.f32 %v2765_v41, %v5281_v62 }
 0x31d   : > { %v2769_v25 = vpop.f32.mrf.mxu1 }
 0x31e   : > { %2873 = vst [vmem:[%s4639_s16 + $0x118] sm:$0xff] %v2766_v9  ;;  %v2770_v26 = vadd.f32 %v2769_v25, %v5274_v21 }
 0x31f   : > { %v2771_v27 = vpop.f32.mrf.mxu1 }
 0x320   : > { %2890 = vst [vmem:[%s4639_s16 + $0x1a0] sm:$0xff] %v2770_v26  ;;  %v2772_v29 = vadd.f32 %v2771_v27, %v5281_v62 }
 0x321   : > { %v2773_v30 = vpop.f32.mrf.mxu1 }
 0x322   : > { %2891 = vst [vmem:[%s4639_s16 + $0x1a8] sm:$0xff] %v2772_v29  ;;  %v2774_v34 = vadd.f32 %v2773_v30, %v5274_v21 }
 0x323   : > { %v2775_v35 = vpop.f32.mrf.mxu1 }
 0x324   : > { %2908 = vst [vmem:[%s4639_s16 + $0x230] sm:$0xff] %v2774_v34  ;;  %v2776_v36 = vadd.f32 %v2775_v35, %v5281_v62 }
 0x325   : > { %v2779_v38 = vpop.f32.mrf.mxu1 }
 0x326   : > { %2909 = vst [vmem:[%s4639_s16 + $0x238] sm:$0xff] %v2776_v36  ;;  %v2780_v42 = vadd.f32 %v2779_v38, %v5274_v21 }
 0x327   : > { %v2781_v63 = vpop.f32.mrf.mxu1 }
 0x328   : > { %2926 = vst [vmem:[%s4639_s16 + $0x2c0] sm:$0xff] %v2780_v42  ;;  %v2782_v2 = vadd.f32 %v2781_v63, %v5281_v62 }
 0x329   : > { %v2783_v11 = vpop.f32.mrf.mxu1 }
 0x32a   : > { %2927 = vst [vmem:[%s4639_s16 + $0x2c8] sm:$0xff] %v2782_v2  ;;  %v2784_v32 = vadd.f32 %v2783_v11, %v5274_v21 }
 0x32b   : > { %v2785_v45 = vpop.f32.mrf.mxu1 }
 0x32c   : > { %2944 = vst [vmem:[%s4639_s16 + $0x350] sm:$0xff] %v2784_v32  ;;  %v2786_v51 = vadd.f32 %v2785_v45, %v5281_v62 }
 0x32d   : > { %v2789_v55 = vpop.f32.mrf.mxu1 }
 0x32e   : > { %2945 = vst [vmem:[%s4639_s16 + $0x358] sm:$0xff] %v2786_v51  ;;  %v2790_v28 = vadd.f32 %v2789_v55, %v5274_v21 }
 0x32f   : > { %v2791_v52 = vpop.f32.mrf.mxu1 }
 0x330   : > { %2962 = vst [vmem:[%s4639_s16 + $0x3e0] sm:$0xff] %v2790_v28  ;;  %v2792_v54 = vadd.f32 %v2791_v52, %v5281_v62 }
 0x331   : > { %v2793_v13 = vpop.f32.mrf.mxu1 }
 0x332   : > { %2963 = vst [vmem:[%s4639_s16 + $0x3e8] sm:$0xff] %v2792_v54  ;;  %v2794_v3 = vadd.f32 %v2793_v13, %v5274_v21 }
 0x333   : > { %v2795_v57 = vpop.f32.mrf.mxu1 }
 0x334   : > { %2980 = vst [vmem:[%s4639_s16 + $0x470] sm:$0xff] %v2794_v3  ;;  %v2796_v58 = vadd.f32 %v2795_v57, %v5281_v62 }
 0x335   : > { %v2799_v61 = vpop.f32.mrf.mxu1 }
 0x336   : > { %2981 = vst [vmem:[%s4639_s16 + $0x478] sm:$0xff] %v2796_v58  ;;  %v2800_v14 = vadd.f32 %v2799_v61, %v5274_v21 }
 0x337   : > { %v2801_v0 = vpop.f32.mrf.mxu1 }
 0x338   : > { %2998 = vst [vmem:[%s4639_s16 + $0x500] sm:$0xff] %v2800_v14  ;;  %v2802_v16 = vadd.f32 %v2801_v0, %v5281_v62 }
 0x339   : > { %v2803_v6 = vpop.f32.mrf.mxu1 }
 0x33a   : > { %2999 = vst [vmem:[%s4639_s16 + $0x508] sm:$0xff] %v2802_v16  ;;  %v2804_v33 = vadd.f32 %v2803_v6, %v5274_v21 }
 0x33b   : > { %v2805_v7 = vpop.f32.mrf.mxu1 }
 0x33c   : > { %3016 = vst [vmem:[%s4639_s16 + $0x590] sm:$0xff] %v2804_v33  ;;  %v2806_v4 = vadd.f32 %v2805_v7, %v5281_v62 }
 0x33d   : > { %v2809_v37 = vpop.f32.mrf.mxu1 }
 0x33e   : > { %3017 = vst [vmem:[%s4639_s16 + $0x598] sm:$0xff] %v2806_v4  ;;  %v2810_v48 = vadd.f32 %v2809_v37, %v5274_v21 }
 0x33f   : > { %v2811_v5 = vpop.f32.mrf.mxu1 }
 0x340   : > { %3034 = vst [vmem:[%s4639_s16 + $0x620] sm:$0xff] %v2810_v48  ;;  %v2812_v12 = vadd.f32 %v2811_v5, %v5281_v62 }
 0x341   : > { %v2813_v60 = vpop.f32.mrf.mxu1 }
 0x342   : > { %3035 = vst [vmem:[%s4639_s16 + $0x628] sm:$0xff] %v2812_v12  ;;  %v2814_v31 = vadd.f32 %v2813_v60, %v5274_v21 }
 0x343   : > { %v2815_v18 = vpop.f32.mrf.mxu1 }
 0x344   : > { %3052 = vst [vmem:[%s4639_s16 + $0x6b0] sm:$0xff] %v2814_v31  ;;  %v2816_v43 = vadd.f32 %v2815_v18, %v5281_v62 }
 0x345   : > { %v2819_v44 = vpop.f32.mrf.mxu1 }
 0x346   : > { %3053 = vst [vmem:[%s4639_s16 + $0x6b8] sm:$0xff] %v2816_v43  ;;  %v2820_v19 = vadd.f32 %v2819_v44, %v5274_v21 }
 0x347   : > { %v2821_v20 = vpop.f32.mrf.mxu1 }
 0x348   : > { %3070 = vst [vmem:[%s4639_s16 + $0x740] sm:$0xff] %v2820_v19  ;;  %v2822_v56 = vadd.f32 %v2821_v20, %v5281_v62 }
 0x349   : > { %v2823_v59 = vpop.f32.mrf.mxu1 }
 0x34a   : > { %3071 = vst [vmem:[%s4639_s16 + $0x748] sm:$0xff] %v2822_v56  ;;  %v2824_v50 = vadd.f32 %v2823_v59, %v5274_v21 }
 0x34b   : > { %v2825_v46 = vpop.f32.mrf.mxu1 }
 0x34c   : > { %3088 = vst [vmem:[%s4639_s16 + $0x7d0] sm:$0xff] %v2824_v50  ;;  %v2826_v8 = vadd.f32 %v2825_v46, %v5281_v62 }
 0x34d   : > { %v2829_v47 = vpop.f32.mrf.mxu1 }
 0x34e   : > { %3089 = vst [vmem:[%s4639_s16 + $0x7d8] sm:$0xff] %v2826_v8  ;;  %v2830_v53 = vadd.f32 %v2829_v47, %v5274_v21 }
 0x34f   : > { %v2831_v49 = vpop.f32.mrf.mxu1 }
 0x350   : > { %3106 = vst [vmem:[%s4639_s16 + $0x860] sm:$0xff] %v2830_v53  ;;  %v2832_v40 = vadd.f32 %v2831_v49, %v5281_v62 }
 0x351   : > { %v2833_v22 = vpop.f32.mrf.mxu1 }
 0x352   : > { %3107 = vst [vmem:[%s4639_s16 + $0x868] sm:$0xff] %v2832_v40  ;;  %v2834_v23 = vadd.f32 %v2833_v22, %v5274_v21 }
 0x353   : > { %v2835_v15 = vpop.f32.mrf.mxu1 }
 0x354   : > { %3124 = vst [vmem:[%s4639_s16 + $0x8f0] sm:$0xff] %v2834_v23  ;;  %v2836_v10 = vadd.f32 %v2835_v15, %v5281_v62 }
 0x356   : > { %3125 = vst [vmem:[%s4639_s16 + $0x8f8] sm:$0xff] %v2836_v10 }
 0x357   : > { %4046 = shalt.err (!%p4043_p3)
}
 0x358   : > { %s4047_s26 = scalar_lea.hbm %s5351_s14, 36864  ;;  %s4051_s15 = scalar_lea.hbm %s5404_s5, 73728 }
 0x359   : > { %p4048_p2 = scmp.ne.s32.totalorder %s5351_s14, %s4047_s26  ;;  %p4052_p5 = scmp.lt.s32.totalorder %s5351_s14, %s5404_s5 }
 0x35a   : > { %p4053_p4 = scmp.lt.s32.totalorder %s4051_s15, %s4047_s26 }
 0x35b   : > { %p4049_p9 = pnand %p4048_p2, %p5422_p12 }
 0x35c   : > { %p4054_p6 = por %p4053_p4, %p4052_p5 }
 0x35d   : > { %p4050_p11 = pneg %p4049_p9 }
 0x35f   : > { %p4055_p8 = pnand %p4054_p6, %p4050_p11 }
 0x361   : > { %4058 = shalt.err (!%p4055_p8)
}
 0x362   : > { %s4117_s17 = smov 2304   ;;  %s4118_s11 = smov 144  }
 0x363   : > { %3564 = dma.vmem_to_hbm [thread:$0]  (%p5422_p12), %s5353_s9, 36864, %s5351_s14, %s3127_s22, %s4117_s17, %s4117_s17, %s4118_s11  }
 0x364 PF: > { %s3156_s12 = sand.u32 1, %s4093_s18   ;;  %p5423_p7 = scmp.ne.s32.totalorder %s5410_s25, 0 }
 0x365   : > { %p5424_p10 = scmp.ge.s32.totalorder %s4105_s21, 2  ;;  %s3157_s23 = scalar_lea.sflag [#allocation4], %s3156_s12 }
 0x367   : > { %p3581_p13 = pnand %p5424_p10, %p5423_p7 }
 0x369   : > { %p3582_p0 = pneg %p3581_p13 }
 0x36b   : > { %4088 = dma.done.wait (%p3582_p0), %s3157_s23, 36864  }
 0x36c   : > { %4090 = vsyncadd (%p3582_p0), %s3157_s23, 4294930432  ;;  %p20_p1 = scmp.ge.s32.totalorder %s4229_s28, 4   ;;  %s5425_s18 = smov %s4097_s19 }
 0x36d   : > { %s5426_s19 = smov %s4101_s20  ;;  %s5427_s20 = smov %s4239_s6 }
 0x36e   : > { %s5428_s21 = smov %s4229_s28  ;;  %22 = sbr.rel (!%p20_p1) target bundleno = 7 (0x7), region = 97 }
 0x373   :  { %3162 = vsyncpa [#allocation3], 1 }
 0x374   :  { %3164 = vsyncpa [#allocation3 + $0x1], 1 }
 0x375   :  { %3165 = vsyncpa [#allocation6], 1 }
 0x376   :  { %3166 = vsyncpa [#allocation9], 1 }
 0x377   :  { %3167 = vsyncpa [#allocation4], 1 }
 0x378   :  { %3169 = vsyncpa [#allocation4 + $0x1], 1 }

</bundles_post_ra>
